<compile_context>
chip_gen: v7x
topology: tpu7x:2x2x1
jax: 0.10.0
libtpu: 0.0.40
codegen_flags: <defaults>
</compile_context>

<pallas_src>
import jax
import jax.numpy as jnp
import numpy as np
from jax.experimental import pallas as pl
from jax.experimental.pallas import tpu as pltpu

_LANES = 128

# real / padded channel counts
_C0, _C1, _C2, _C3 = 8, 18, 30, 8
_C0P, _C1P, _C2P, _C3P = 8, 24, 32, 8
_K1, _K2, _K3 = 9, 5, 9


def _round_up(a, m):
    return ((a + m - 1) // m) * m


# ----------------------------- Pallas kernel ------------------------------- #

def _build_convseq_call(nb, H, tb, has_oldskip, compute_dtype, vmem_limit):
    """Builds the pallas_call for a given tiling / specialization."""
    L = H * tb

    def conv_layer(x, w_ref, K, pad):
        # x: [cin_p, L] (lane index = h*tb + t);  w_ref: [cout_p, K*cin_p]
        cin_p = x.shape[0]
        zl = jnp.zeros((cin_p, pad * tb), dtype=x.dtype)
        zr = jnp.zeros((cin_p, (K - 1 - pad) * tb), dtype=x.dtype)
        xp = jnp.concatenate([zl, x, zr], axis=1)            # [cin_p, (H+K-1)*tb]
        # im2col: K lane-aligned windows stacked on the sublane axis.
        xcol = jnp.concatenate(
            [xp[:, k * tb: k * tb + L] for k in range(K)], axis=0)   # [K*cin_p, L]
        return jnp.dot(w_ref[...].astype(compute_dtype),
                       xcol.astype(compute_dtype),
                       preferred_element_type=jnp.float32)    # [cout_p, L] f32

    def relu_bn(h, sc_ref, sh_ref):
        # sc/sh are (C_pad, 1): broadcast along lanes, no in-kernel reshape.
        return jnp.maximum(h, 0.0) * sc_ref[...] + sh_ref[...]

    def kernel(*refs):
        if has_oldskip:
            (x_ref, os_ref, w1_ref, w2_ref, w3_ref,
             sc1_ref, sh1_ref, sc2_ref, sh2_ref, sc3_ref, sh3_ref,
             out_ref, skip_ref) = refs
        else:
            (x_ref, w1_ref, w2_ref, w3_ref,
             sc1_ref, sh1_ref, sc2_ref, sh2_ref, sc3_ref, sh3_ref,
             out_ref, skip_ref) = refs

        x = x_ref[0].astype(jnp.float32)                      # [8, L]

        # ConvBlock 1: 8 -> 18 (pad 24), K=9
        a1 = relu_bn(conv_layer(x, w1_ref, _K1, 4), sc1_ref, sh1_ref)

        # ConvBlock 2: 18 -> 30 (pad 32), K=5; pre-ReLU (+oldskip) is the skip.
        s2 = conv_layer(a1, w2_ref, _K2, 2)
        if has_oldskip:
            s2 = s2 + os_ref[0].astype(jnp.float32)
        a2 = relu_bn(s2, sc2_ref, sh2_ref)

        # ConvBlock 3: 30 -> 8, K=9
        a3 = relu_bn(conv_layer(a2, w3_ref, _K3, 4), sc3_ref, sh3_ref)

        out_ref[0] = a3.astype(out_ref.dtype)                 # [8, L]  lane-dense
        skip_ref[0] = s2[:_C2, :].astype(skip_ref.dtype)      # [30, L] lane-dense

    act = lambda c: pl.BlockSpec((1, c, L), lambda i: (i, 0, 0))
    full = lambda shape: pl.BlockSpec(shape, lambda i: (0,) * len(shape))

    in_specs = [act(_C0P)]
    if has_oldskip:
        in_specs.append(act(_C2P))
    in_specs += [
        full((_C1P, _K1 * _C0P)),        # w1  [24, 72]
        full((_C2P, _K2 * _C1P)),        # w2  [32, 120]
        full((_C3P, _K3 * _C2P)),        # w3  [8, 288]
        full((_C1P, 1)), full((_C1P, 1)),
        full((_C2P, 1)), full((_C2P, 1)),
        full((_C3P, 1)), full((_C3P, 1)),
    ]

    return pl.pallas_call(
        kernel,
        grid=(nb,),
        in_specs=in_specs,
        out_specs=[act(_C3), act(_C2)],
        out_shape=(
            jax.ShapeDtypeStruct((nb, _C3, L), jnp.float32),
            jax.ShapeDtypeStruct((nb, _C2, L), jnp.float32),
        ),
        compiler_params=pltpu.CompilerParams(
            dimension_semantics=("parallel",),
            vmem_limit_bytes=vmem_limit),
    )


# ------------------------------ JAX wrapper -------------------------------- #

def _choose_cols(B, block_cols):
    tb = 256 if block_cols is None else block_cols
    tb = max(_LANES, (tb // _LANES) * _LANES)
    tb = min(tb, _round_up(B, _LANES))
    B_pad = _round_up(B, tb)
    # Keep >= 2 grid steps when data allows it (feeds both v7x TensorCores).
    if B_pad // tb == 1 and tb > _LANES and B > _LANES:
        tb = max(_LANES, (tb // 2) // _LANES * _LANES)
        B_pad = _round_up(B, tb)
    return tb, B_pad, B_pad // tb


def _vmem_limit_bytes():
    try:
        info = pltpu.get_tpu_info()
        phys = getattr(info, "vmem_capacity_bytes", None) or 64 * 2**20
    except Exception:
        phys = 64 * 2**20                       # conservative (v7x-sized) fallback
    return int(min(96 * 2**20, phys * 0.7))


def _nchw_to_blocks(a, B, B_pad, tb):
    """[N, C, H, W] -> [nb, C, H*tb] with lane index = h*tb + (local batch col)."""
    N, C, H, W = a.shape
    x = jnp.transpose(a, (0, 3, 1, 2)).reshape(B, C, H)
    if B_pad != B:
        x = jnp.pad(x, ((0, B_pad - B), (0, 0), (0, 0)))
    nb = B_pad // tb
    x = jnp.transpose(x.reshape(nb, tb, C, H), (0, 2, 3, 1))  # [nb, C, H, tb]
    return x.reshape(nb, C, H * tb)


def _blocks_to_nchw(y, N, W, C, H, B, tb):
    nb = y.shape[0]
    y = y.reshape(nb, C, H, tb)
    y = jnp.transpose(y, (0, 3, 1, 2)).reshape(nb * tb, C, H)[:B]
    y = y.reshape(N, W, C, H)
    return jnp.transpose(y, (0, 2, 3, 1))                     # [N, C, H, W]


def _prep_weight(w_kio, cin_pad, cout_pad):
    """[K, Cin, Cout] -> zero-padded, im2col-matched 2-D weight [Cout_p, K*Cin_p]."""
    K, cin, cout = w_kio.shape
    wp = jnp.zeros((K, cin_pad, cout_pad), w_kio.dtype).at[:, :cin, :cout].set(w_kio)
    return wp.reshape(K * cin_pad, cout_pad).T


def _prep_bn(sc, sh, cpad):
    c = sc.shape[0]
    scp = jnp.zeros((cpad, 1), jnp.float32).at[:c, 0].set(sc)
    shp = jnp.zeros((cpad, 1), jnp.float32).at[:c, 0].set(sh)
    return scp, shp


def conv_seq_forward(x_nchw, params, oldskip_nchw=None, *,
                     block_cols=None, compute_dtype=jnp.float32):
    """ConvSeq.forward.  x: [N, 8, H, W] f32 -> (out [N,8,H,W], skip [N,30,H,W]).

    compute_dtype=jnp.bfloat16 enables bf16 MXU operands (f32 accumulation) on
    v6e/v7x; default keeps full f32 numerics.
    """
    N, Cin, H, W = x_nchw.shape
    assert Cin == _C0, "ConvSeq expects 8 input channels"
    B = N * W
    tb, B_pad, nb = _choose_cols(B, block_cols)

    args = [_nchw_to_blocks(x_nchw.astype(jnp.float32), B, B_pad, tb)]
    has_old = oldskip_nchw is not None
    if has_old:
        os = jnp.pad(oldskip_nchw.astype(jnp.float32),
                     ((0, 0), (0, _C2P - _C2), (0, 0), (0, 0)))
        args.append(_nchw_to_blocks(os, B, B_pad, tb))

    w1 = _prep_weight(params["w1"], _C0P, _C1P)
    w2 = _prep_weight(params["w2"], _C1P, _C2P)
    w3 = _prep_weight(params["w3"], _C2P, _C3P)
    sc1, sh1 = _prep_bn(params["sc1"], params["sh1"], _C1P)
    sc2, sh2 = _prep_bn(params["sc2"], params["sh2"], _C2P)
    sc3, sh3 = _prep_bn(params["sc3"], params["sh3"], _C3P)
    args += [w1, w2, w3, sc1, sh1, sc2, sh2, sc3, sh3]

    call = _build_convseq_call(nb, H, tb, has_old, compute_dtype,
                               _vmem_limit_bytes())
    out_b, skip_b = call(*args)

    out = _blocks_to_nchw(out_b, N, W, _C3, H, B, tb)
    skip = _blocks_to_nchw(skip_b, N, W, _C2, H, B, tb)
    return out, skip


# --------------------------- plain-JAX reference ---------------------------- #

def reference_forward(x_nchw, params, oldskip_nchw=None):
    def conv(inp, w_kio):  # w_kio: [K, Cin, Cout] -> OIHW [Cout, Cin, K, 1]
        w_oihw = jnp.transpose(w_kio, (2, 1, 0))[:, :, :, None]
        return jax.lax.conv_general_dilated(
            inp, w_oihw, window_strides=(1, 1), padding="SAME",
            dimension_numbers=("NCHW", "OIHW", "NCHW"))

    def bn(inp, sc, sh):
        return inp * sc[None, :, None, None] + sh[None, :, None, None]

    h1 = conv(x_nchw, params["w1"])
    a1 = bn(jax.nn.relu(h1), params["sc1"], params["sh1"])
    s2 = conv(a1, params["w2"])
    if oldskip_nchw is not None:
        s2 = s2 + oldskip_nchw
    a2 = bn(jax.nn.relu(s2), params["sc2"], params["sh2"])
    h3 = conv(a2, params["w3"])
    a3 = bn(jax.nn.relu(h3), params["sc3"], params["sh3"])
    return a3, s2


# ----------------------------- parameter init ------------------------------- #

def init_params(key):
    ks = jax.random.split(key, 16)
    eps = 1e-5

    def bn_fold(kg, kb, km, kv, c):
        gamma = 1.0 + 0.1 * jax.random.normal(kg, (c,), jnp.float32)
        beta = 0.1 * jax.random.normal(kb, (c,), jnp.float32)
        mean = 0.1 * jax.random.normal(km, (c,), jnp.float32)
        var = jax.random.uniform(kv, (c,), jnp.float32, 0.5, 1.5)
        scale = gamma / jnp.sqrt(var + eps)
        shift = beta - mean * scale
        return scale, shift

    w1 = 0.1 * jax.random.normal(ks[0], (9, 8, 18), jnp.float32)   # [K, Cin, Cout]
    w2 = 0.1 * jax.random.normal(ks[1], (5, 18, 30), jnp.float32)
    w3 = 0.1 * jax.random.normal(ks[2], (9, 30, 8), jnp.float32)
    sc1, sh1 = bn_fold(ks[3], ks[4], ks[5], ks[6], 18)
    sc2, sh2 = bn_fold(ks[7], ks[8], ks[9], ks[10], 30)
    sc3, sh3 = bn_fold(ks[11], ks[12], ks[13], ks[14], 8)
    return dict(w1=w1, w2=w2, w3=w3,
                sc1=sc1, sh1=sh1, sc2=sc2, sh2=sh2, sc3=sc3, sh3=sh3)


# ----------------------------------- main ----------------------------------- #

if __name__ == "__main__":
    key = jax.random.PRNGKey(0)
    kp, kx = jax.random.split(key)
    params = init_params(kp)

    # PyTorch-style NCHW input: batch=2, in_channels=8, H=16, W=16
    x = jax.random.normal(kx, (2, 8, 16, 16), jnp.float32)

    # Pass 1: no incoming skip (specialized kernel without the oldskip operand).
    out1, skip1 = conv_seq_forward(x, params)
    out1, skip1 = jax.block_until_ready((out1, skip1))
    r_out1, r_skip1 = reference_forward(x, params)
    np.testing.assert_allclose(np.asarray(out1), np.asarray(r_out1), rtol=1e-4, atol=5e-4)
    np.testing.assert_allclose(np.asarray(skip1), np.asarray(r_skip1), rtol=1e-4, atol=5e-4)

    # Pass 2: with an incoming skip (exercises the oldskip-add path).
    out2, skip2 = conv_seq_forward(x, params, oldskip_nchw=skip1)
    out2, skip2 = jax.block_until_ready((out2, skip2))
    r_out2, r_skip2 = reference_forward(x, params, oldskip_nchw=r_skip1)
    np.testing.assert_allclose(np.asarray(out2), np.asarray(r_out2), rtol=1e-4, atol=5e-4)
    np.testing.assert_allclose(np.asarray(skip2), np.asarray(r_skip2), rtol=1e-4, atol=5e-4)

    assert out1.shape == (2, 8, 16, 16) and skip1.shape == (2, 30, 16, 16)
    print("KERNEL_OK")
</pallas_src>

<mosaic_0001>
module attributes {stable_mosaic.version = 11 : i64} {
  func.func @kernel(%arg0: i32, %arg1: memref<1x8x2048xf32, #tpu.memory_space<vmem>>, %arg2: memref<24x72xf32, #tpu.memory_space<vmem>>, %arg3: memref<32x120xf32, #tpu.memory_space<vmem>>, %arg4: memref<8x288xf32, #tpu.memory_space<vmem>>, %arg5: memref<24x1xf32, #tpu.memory_space<vmem>>, %arg6: memref<24x1xf32, #tpu.memory_space<vmem>>, %arg7: memref<32x1xf32, #tpu.memory_space<vmem>>, %arg8: memref<32x1xf32, #tpu.memory_space<vmem>>, %arg9: memref<8x1xf32, #tpu.memory_space<vmem>>, %arg10: memref<8x1xf32, #tpu.memory_space<vmem>>, %arg11: memref<1x8x2048xf32, #tpu.memory_space<vmem>>, %arg12: memref<1x30x2048xf32, #tpu.memory_space<vmem>>) attributes {dimension_semantics = [#tpu.dimension_semantics<parallel>], iteration_bounds = array<i64: 1>, scalar_prefetch = 0 : i64, scratch_operands = 0 : i64, tpu.core_type = #tpu.core_type<tc>, window_params = [{transform_indices = @transform_0, window_bounds = array<i64: 1, 8, 2048>}, {pipeline_mode = #tpu.pipeline_mode<synchronous>, transform_indices = @transform_1, window_bounds = array<i64: 24, 72>}, {pipeline_mode = #tpu.pipeline_mode<synchronous>, transform_indices = @transform_2, window_bounds = array<i64: 32, 120>}, {pipeline_mode = #tpu.pipeline_mode<synchronous>, transform_indices = @transform_3, window_bounds = array<i64: 8, 288>}, {pipeline_mode = #tpu.pipeline_mode<synchronous>, transform_indices = @transform_4, window_bounds = array<i64: 24, 1>}, {pipeline_mode = #tpu.pipeline_mode<synchronous>, transform_indices = @transform_5, window_bounds = array<i64: 24, 1>}, {pipeline_mode = #tpu.pipeline_mode<synchronous>, transform_indices = @transform_6, window_bounds = array<i64: 32, 1>}, {pipeline_mode = #tpu.pipeline_mode<synchronous>, transform_indices = @transform_7, window_bounds = array<i64: 32, 1>}, {pipeline_mode = #tpu.pipeline_mode<synchronous>, transform_indices = @transform_8, window_bounds = array<i64: 8, 1>}, {pipeline_mode = #tpu.pipeline_mode<synchronous>, transform_indices = @transform_9, window_bounds = array<i64: 8, 1>}, {transform_indices = @transform_10, window_bounds = array<i64: 1, 8, 2048>}, {transform_indices = @transform_11, window_bounds = array<i64: 1, 30, 2048>}]} {
    %c0 = arith.constant 0 : index
    %c0_0 = arith.constant 0 : index
    %c0_1 = arith.constant 0 : index
    %0 = vector.load %arg1[%c0, %c0_0, %c0_1] : memref<1x8x2048xf32, #tpu.memory_space<vmem>>, vector<1x8x2048xf32>
    %1 = vector.shape_cast %0 : vector<1x8x2048xf32> to vector<8x2048xf32>
    %cst = arith.constant 0.000000e+00 : f32
    %2 = vector.broadcast %cst : f32 to vector<8x512xf32>
    %cst_2 = arith.constant 0.000000e+00 : f32
    %3 = vector.broadcast %cst_2 : f32 to vector<8x512xf32>
    %4 = tpu.concatenate %2, %1, %3 in 1 : vector<8x512xf32>, vector<8x2048xf32>, vector<8x512xf32> -> vector<8x3072xf32>
    %5 = vector.extract_strided_slice %4 {offsets = [0, 0], sizes = [8, 2048], strides = [1, 1]} : vector<8x3072xf32> to vector<8x2048xf32>
    %6 = vector.extract_strided_slice %4 {offsets = [0, 128], sizes = [8, 2048], strides = [1, 1]} : vector<8x3072xf32> to vector<8x2048xf32>
    %7 = vector.extract_strided_slice %4 {offsets = [0, 256], sizes = [8, 2048], strides = [1, 1]} : vector<8x3072xf32> to vector<8x2048xf32>
    %8 = vector.extract_strided_slice %4 {offsets = [0, 384], sizes = [8, 2048], strides = [1, 1]} : vector<8x3072xf32> to vector<8x2048xf32>
    %9 = vector.extract_strided_slice %4 {offsets = [0, 512], sizes = [8, 2048], strides = [1, 1]} : vector<8x3072xf32> to vector<8x2048xf32>
    %10 = vector.extract_strided_slice %4 {offsets = [0, 640], sizes = [8, 2048], strides = [1, 1]} : vector<8x3072xf32> to vector<8x2048xf32>
    %11 = vector.extract_strided_slice %4 {offsets = [0, 768], sizes = [8, 2048], strides = [1, 1]} : vector<8x3072xf32> to vector<8x2048xf32>
    %12 = vector.extract_strided_slice %4 {offsets = [0, 896], sizes = [8, 2048], strides = [1, 1]} : vector<8x3072xf32> to vector<8x2048xf32>
    %13 = vector.extract_strided_slice %4 {offsets = [0, 1024], sizes = [8, 2048], strides = [1, 1]} : vector<8x3072xf32> to vector<8x2048xf32>
    %14 = tpu.concatenate %5, %6, %7, %8, %9, %10, %11, %12, %13 in 0 : vector<8x2048xf32>, vector<8x2048xf32>, vector<8x2048xf32>, vector<8x2048xf32>, vector<8x2048xf32>, vector<8x2048xf32>, vector<8x2048xf32>, vector<8x2048xf32>, vector<8x2048xf32> -> vector<72x2048xf32>
    %c0_3 = arith.constant 0 : index
    %c0_4 = arith.constant 0 : index
    %15 = vector.load %arg2[%c0_3, %c0_4] : memref<24x72xf32, #tpu.memory_space<vmem>>, vector<24x72xf32>
    %cst_5 = arith.constant dense<0.000000e+00> : vector<24x2048xf32>
    %16 = tpu.matmul %15, %14, %cst_5 {dimension_numbers = #tpu.dot_dimension_numbers<[1], [0], [0], [1], [0, 0, 1, 1], [], []>} : vector<24x72xf32>, vector<72x2048xf32>, vector<24x2048xf32> -> vector<24x2048xf32>
    %cst_6 = arith.constant 0.000000e+00 : f32
    %17 = vector.broadcast %cst_6 : f32 to vector<24x2048xf32>
    %18 = arith.maximumf %16, %17 : vector<24x2048xf32>
    %c0_7 = arith.constant 0 : index
    %c0_8 = arith.constant 0 : index
    %19 = vector.load %arg5[%c0_7, %c0_8] : memref<24x1xf32, #tpu.memory_space<vmem>>, vector<24x1xf32>
    %20 = vector.broadcast %19 : vector<24x1xf32> to vector<24x2048xf32>
    %21 = arith.mulf %18, %20 : vector<24x2048xf32>
    %c0_9 = arith.constant 0 : index
    %c0_10 = arith.constant 0 : index
    %22 = vector.load %arg6[%c0_9, %c0_10] : memref<24x1xf32, #tpu.memory_space<vmem>>, vector<24x1xf32>
    %23 = vector.broadcast %22 : vector<24x1xf32> to vector<24x2048xf32>
    %24 = arith.addf %21, %23 : vector<24x2048xf32>
    %cst_11 = arith.constant 0.000000e+00 : f32
    %25 = vector.broadcast %cst_11 : f32 to vector<24x256xf32>
    %cst_12 = arith.constant 0.000000e+00 : f32
    %26 = vector.broadcast %cst_12 : f32 to vector<24x256xf32>
    %27 = tpu.concatenate %25, %24, %26 in 1 : vector<24x256xf32>, vector<24x2048xf32>, vector<24x256xf32> -> vector<24x2560xf32>
    %28 = vector.extract_strided_slice %27 {offsets = [0, 0], sizes = [24, 2048], strides = [1, 1]} : vector<24x2560xf32> to vector<24x2048xf32>
    %29 = vector.extract_strided_slice %27 {offsets = [0, 128], sizes = [24, 2048], strides = [1, 1]} : vector<24x2560xf32> to vector<24x2048xf32>
    %30 = vector.extract_strided_slice %27 {offsets = [0, 256], sizes = [24, 2048], strides = [1, 1]} : vector<24x2560xf32> to vector<24x2048xf32>
    %31 = vector.extract_strided_slice %27 {offsets = [0, 384], sizes = [24, 2048], strides = [1, 1]} : vector<24x2560xf32> to vector<24x2048xf32>
    %32 = vector.extract_strided_slice %27 {offsets = [0, 512], sizes = [24, 2048], strides = [1, 1]} : vector<24x2560xf32> to vector<24x2048xf32>
    %33 = tpu.concatenate %28, %29, %30, %31, %32 in 0 : vector<24x2048xf32>, vector<24x2048xf32>, vector<24x2048xf32>, vector<24x2048xf32>, vector<24x2048xf32> -> vector<120x2048xf32>
    %c0_13 = arith.constant 0 : index
    %c0_14 = arith.constant 0 : index
    %34 = vector.load %arg3[%c0_13, %c0_14] : memref<32x120xf32, #tpu.memory_space<vmem>>, vector<32x120xf32>
    %cst_15 = arith.constant dense<0.000000e+00> : vector<32x2048xf32>
    %35 = tpu.matmul %34, %33, %cst_15 {dimension_numbers = #tpu.dot_dimension_numbers<[1], [0], [0], [1], [0, 0, 1, 1], [], []>} : vector<32x120xf32>, vector<120x2048xf32>, vector<32x2048xf32> -> vector<32x2048xf32>
    %cst_16 = arith.constant 0.000000e+00 : f32
    %36 = vector.broadcast %cst_16 : f32 to vector<32x2048xf32>
    %37 = arith.maximumf %35, %36 : vector<32x2048xf32>
    %c0_17 = arith.constant 0 : index
    %c0_18 = arith.constant 0 : index
    %38 = vector.load %arg7[%c0_17, %c0_18] : memref<32x1xf32, #tpu.memory_space<vmem>>, vector<32x1xf32>
    %39 = vector.broadcast %38 : vector<32x1xf32> to vector<32x2048xf32>
    %40 = arith.mulf %37, %39 : vector<32x2048xf32>
    %c0_19 = arith.constant 0 : index
    %c0_20 = arith.constant 0 : index
    %41 = vector.load %arg8[%c0_19, %c0_20] : memref<32x1xf32, #tpu.memory_space<vmem>>, vector<32x1xf32>
    %42 = vector.broadcast %41 : vector<32x1xf32> to vector<32x2048xf32>
    %43 = arith.addf %40, %42 : vector<32x2048xf32>
    %cst_21 = arith.constant 0.000000e+00 : f32
    %44 = vector.broadcast %cst_21 : f32 to vector<32x512xf32>
    %cst_22 = arith.constant 0.000000e+00 : f32
    %45 = vector.broadcast %cst_22 : f32 to vector<32x512xf32>
    %46 = tpu.concatenate %44, %43, %45 in 1 : vector<32x512xf32>, vector<32x2048xf32>, vector<32x512xf32> -> vector<32x3072xf32>
    %47 = vector.extract_strided_slice %46 {offsets = [0, 0], sizes = [32, 2048], strides = [1, 1]} : vector<32x3072xf32> to vector<32x2048xf32>
    %48 = vector.extract_strided_slice %46 {offsets = [0, 128], sizes = [32, 2048], strides = [1, 1]} : vector<32x3072xf32> to vector<32x2048xf32>
    %49 = vector.extract_strided_slice %46 {offsets = [0, 256], sizes = [32, 2048], strides = [1, 1]} : vector<32x3072xf32> to vector<32x2048xf32>
    %50 = vector.extract_strided_slice %46 {offsets = [0, 384], sizes = [32, 2048], strides = [1, 1]} : vector<32x3072xf32> to vector<32x2048xf32>
    %51 = vector.extract_strided_slice %46 {offsets = [0, 512], sizes = [32, 2048], strides = [1, 1]} : vector<32x3072xf32> to vector<32x2048xf32>
    %52 = vector.extract_strided_slice %46 {offsets = [0, 640], sizes = [32, 2048], strides = [1, 1]} : vector<32x3072xf32> to vector<32x2048xf32>
    %53 = vector.extract_strided_slice %46 {offsets = [0, 768], sizes = [32, 2048], strides = [1, 1]} : vector<32x3072xf32> to vector<32x2048xf32>
    %54 = vector.extract_strided_slice %46 {offsets = [0, 896], sizes = [32, 2048], strides = [1, 1]} : vector<32x3072xf32> to vector<32x2048xf32>
    %55 = vector.extract_strided_slice %46 {offsets = [0, 1024], sizes = [32, 2048], strides = [1, 1]} : vector<32x3072xf32> to vector<32x2048xf32>
    %56 = tpu.concatenate %47, %48, %49, %50, %51, %52, %53, %54, %55 in 0 : vector<32x2048xf32>, vector<32x2048xf32>, vector<32x2048xf32>, vector<32x2048xf32>, vector<32x2048xf32>, vector<32x2048xf32>, vector<32x2048xf32>, vector<32x2048xf32>, vector<32x2048xf32> -> vector<288x2048xf32>
    %c0_23 = arith.constant 0 : index
    %c0_24 = arith.constant 0 : index
    %57 = vector.load %arg4[%c0_23, %c0_24] : memref<8x288xf32, #tpu.memory_space<vmem>>, vector<8x288xf32>
    %cst_25 = arith.constant dense<0.000000e+00> : vector<8x2048xf32>
    %58 = tpu.matmul %57, %56, %cst_25 {dimension_numbers = #tpu.dot_dimension_numbers<[1], [0], [0], [1], [0, 0, 1, 1], [], []>} : vector<8x288xf32>, vector<288x2048xf32>, vector<8x2048xf32> -> vector<8x2048xf32>
    %cst_26 = arith.constant 0.000000e+00 : f32
    %59 = vector.broadcast %cst_26 : f32 to vector<8x2048xf32>
    %60 = arith.maximumf %58, %59 : vector<8x2048xf32>
    %c0_27 = arith.constant 0 : index
    %c0_28 = arith.constant 0 : index
    %61 = vector.load %arg9[%c0_27, %c0_28] : memref<8x1xf32, #tpu.memory_space<vmem>>, vector<8x1xf32>
    %62 = vector.broadcast %61 : vector<8x1xf32> to vector<8x2048xf32>
    %63 = arith.mulf %60, %62 : vector<8x2048xf32>
    %c0_29 = arith.constant 0 : index
    %c0_30 = arith.constant 0 : index
    %64 = vector.load %arg10[%c0_29, %c0_30] : memref<8x1xf32, #tpu.memory_space<vmem>>, vector<8x1xf32>
    %65 = vector.broadcast %64 : vector<8x1xf32> to vector<8x2048xf32>
    %66 = arith.addf %63, %65 : vector<8x2048xf32>
    %c0_31 = arith.constant 0 : index
    %c0_32 = arith.constant 0 : index
    %c0_33 = arith.constant 0 : index
    %67 = vector.load %arg11[%c0_31, %c0_32, %c0_33] : memref<1x8x2048xf32, #tpu.memory_space<vmem>>, vector<1x8x2048xf32>
    %68 = vector.shape_cast %67 : vector<1x8x2048xf32> to vector<8x2048xf32>
    %69 = vector.shape_cast %66 : vector<8x2048xf32> to vector<1x8x2048xf32>
    tpu.vector_store %arg11[%c0_31, %c0_32, %c0_33], %69 {strides = array<i32>} : memref<1x8x2048xf32, #tpu.memory_space<vmem>>, vector<1x8x2048xf32>,
    %70 = vector.extract_strided_slice %35 {offsets = [0, 0], sizes = [30, 2048], strides = [1, 1]} : vector<32x2048xf32> to vector<30x2048xf32>
    %c0_34 = arith.constant 0 : index
    %c0_35 = arith.constant 0 : index
    %c0_36 = arith.constant 0 : index
    %71 = vector.load %arg12[%c0_34, %c0_35, %c0_36] : memref<1x30x2048xf32, #tpu.memory_space<vmem>>, vector<1x30x2048xf32>
    %72 = vector.shape_cast %71 : vector<1x30x2048xf32> to vector<30x2048xf32>
    %73 = vector.shape_cast %70 : vector<30x2048xf32> to vector<1x30x2048xf32>
    tpu.vector_store %arg12[%c0_34, %c0_35, %c0_36], %73 {strides = array<i32>} : memref<1x30x2048xf32, #tpu.memory_space<vmem>>, vector<1x30x2048xf32>,
    return
  }
  func.func @transform_0(%arg0: i32) -> (i32, i32, i32) {
    %c0_i32 = arith.constant 0 : i32
    %c0_i32_0 = arith.constant 0 : i32
    %c0_i32_1 = arith.constant 0 : i32
    return %arg0, %c0_i32, %c0_i32_0 : i32, i32, i32
  }
  func.func @transform_1(%arg0: i32) -> (i32, i32) {
    %c0_i32 = arith.constant 0 : i32
    %c0_i32_0 = arith.constant 0 : i32
    %c0_i32_1 = arith.constant 0 : i32
    return %c0_i32, %c0_i32_0 : i32, i32
  }
  func.func @transform_2(%arg0: i32) -> (i32, i32) {
    %c0_i32 = arith.constant 0 : i32
    %c0_i32_0 = arith.constant 0 : i32
    %c0_i32_1 = arith.constant 0 : i32
    return %c0_i32, %c0_i32_0 : i32, i32
  }
  func.func @transform_3(%arg0: i32) -> (i32, i32) {
    %c0_i32 = arith.constant 0 : i32
    %c0_i32_0 = arith.constant 0 : i32
    %c0_i32_1 = arith.constant 0 : i32
    return %c0_i32, %c0_i32_0 : i32, i32
  }
  func.func @transform_4(%arg0: i32) -> (i32, i32) {
    %c0_i32 = arith.constant 0 : i32
    %c0_i32_0 = arith.constant 0 : i32
    %c0_i32_1 = arith.constant 0 : i32
    return %c0_i32, %c0_i32_0 : i32, i32
  }
  func.func @transform_5(%arg0: i32) -> (i32, i32) {
    %c0_i32 = arith.constant 0 : i32
    %c0_i32_0 = arith.constant 0 : i32
    %c0_i32_1 = arith.constant 0 : i32
    return %c0_i32, %c0_i32_0 : i32, i32
  }
  func.func @transform_6(%arg0: i32) -> (i32, i32) {
    %c0_i32 = arith.constant 0 : i32
    %c0_i32_0 = arith.constant 0 : i32
    %c0_i32_1 = arith.constant 0 : i32
    return %c0_i32, %c0_i32_0 : i32, i32
  }
  func.func @transform_7(%arg0: i32) -> (i32, i32) {
    %c0_i32 = arith.constant 0 : i32
    %c0_i32_0 = arith.constant 0 : i32
    %c0_i32_1 = arith.constant 0 : i32
    return %c0_i32, %c0_i32_0 : i32, i32
  }
  func.func @transform_8(%arg0: i32) -> (i32, i32) {
    %c0_i32 = arith.constant 0 : i32
    %c0_i32_0 = arith.constant 0 : i32
    %c0_i32_1 = arith.constant 0 : i32
    return %c0_i32, %c0_i32_0 : i32, i32
  }
  func.func @transform_9(%arg0: i32) -> (i32, i32) {
    %c0_i32 = arith.constant 0 : i32
    %c0_i32_0 = arith.constant 0 : i32
    %c0_i32_1 = arith.constant 0 : i32
    return %c0_i32, %c0_i32_0 : i32, i32
  }
  func.func @transform_10(%arg0: i32) -> (i32, i32, i32) {
    %c0_i32 = arith.constant 0 : i32
    %c0_i32_0 = arith.constant 0 : i32
    %c0_i32_1 = arith.constant 0 : i32
    return %arg0, %c0_i32, %c0_i32_0 : i32, i32, i32
  }
  func.func @transform_11(%arg0: i32) -> (i32, i32, i32) {
    %c0_i32 = arith.constant 0 : i32
    %c0_i32_0 = arith.constant 0 : i32
    %c0_i32_1 = arith.constant 0 : i32
    return %arg0, %c0_i32, %c0_i32_0 : i32, i32, i32
  }
}

</mosaic_0001>

<bundles_post_ra>
// kernel: tpu_custom_call.1
= control target key start
LH: loop header
LB: loop body
LE: loop exit
PB: predicated region body
PF: predicated region fallthrough
CT: control target
= control target key end

     0   :  { %17 = vsyncpa [#allocation3], 0  ;;  %s5807_s0 = inlined_call_operand.vmem [shape: f32[1,8,2048], index: 0, kind: input, shape index: {}]   ;;  %s5808_s1 = inlined_call_operand.hbm [shape: f32[24,72], index: 1, kind: input, shape index: {}]   ;;  %s5809_s2 = inlined_call_operand.hbm [shape: f32[32,120], index: 2, kind: input, shape index: {}]   ;;  %s5810_s3 = inlined_call_operand.hbm [shape: f32[8,288], index: 3, kind: input, shape index: {}]   ;;  %s5811_s4 = inlined_call_operand.vmem [shape: f32[24,1], index: 4, kind: input, shape index: {}]   ;;  %s5812_s5 = inlined_call_operand.vmem [shape: f32[24,1], index: 5, kind: input, shape index: {}]   ;;  %s5813_s6 = inlined_call_operand.vmem [shape: f32[32,1], index: 6, kind: input, shape index: {}]   ;;  %s5814_s7 = inlined_call_operand.vmem [shape: f32[32,1], index: 7, kind: input, shape index: {}]   ;;  %s5815_s8 = inlined_call_operand.vmem [shape: f32[8,1], index: 8, kind: input, shape index: {}]   ;;  %s5816_s9 = inlined_call_operand.vmem [shape: f32[8,1], index: 9, kind: input, shape index: {}]   ;;  %s5817_s10 = inlined_call_operand.hbm [shape: f32[1,8,2048], index: 10, kind: output, shape index: {0}]   ;;  %s5818_s11 = inlined_call_operand.vmem [shape: f32[1,30,2048], index: 11, kind: output, shape index: {1}]  }
   0x1   :  { %18 = vsyncpa [#allocation6], 0 }
   0x2   :  { %19 = vsyncpa [#allocation4], 0  ;;  %s4274_s17 = smov [#allocation5]   ;;  %s4275_s19 = smov [#allocation2]  }
   0x3   :  { %s39_s18 = sshll.u32 %s4274_s17, 4  ;;  %s27_s20 = sshll.u32 %s4275_s19, 4  ;;  %s40_s18 = int_to_ptr.vmem [resolvable:$true] %s39_s18  ;;  %s4344_s20 = int_to_ptr.vmem [resolvable:$true] %s27_s20 }
   0x4   :  { %s4180_s23 = scalar_lea.hbm %s5809_s2, 512 }
   0x5   :  { %p4181_p0 = scmp.ne.s32.totalorder %s5809_s2, %s4180_s23  ;;  %p4184_p1 = scmp.lt.u32.totalorder %s4180_s23, %s5809_s2 }
   0x7   :  { %p4186_p2 = pnand %p4184_p1, %p4181_p0 }
   0x9   :  { %4189 = shalt.err (!%p4186_p2)
}
   0xa   :  { %s4190_s28 = scalar_lea.vmem %s40_s18, 512  ;;  %p4195_p4 = scmp.lt.s32.totalorder %s40_s18, %s40_s18 }
   0xb   :  { %p4191_p3 = scmp.ne.s32.totalorder %s40_s18, %s4190_s28  ;;  %p4196_p5 = scmp.lt.s32.totalorder %s4190_s28, %s4190_s28 }
   0xd   :  { %p4197_p6 = por %p4196_p5, %p4195_p4 }
   0xf   :  { %p4198_p7 = pnand %p4197_p6, %p4191_p3 }
  0x11   :  { %4201 = shalt.err (!%p4198_p7)
}
  0x12   :  { %s4276_s29 = smov 128   ;;  %s4277_s30 = smov 8  }
  0x13   :  { %45 = dma.hbm_to_vmem [thread:$0]  %s5809_s2, 512, %s40_s18, [#allocation6], %s4276_s29, %s4276_s29, %s4277_s30  }
  0x14   :  { %s4202_s16 = scalar_lea.hbm %s5808_s1, 384 }
  0x15   :  { %p4203_p8 = scmp.ne.s32.totalorder %s5808_s1, %s4202_s16  ;;  %p4206_p9 = scmp.lt.u32.totalorder %s4202_s16, %s5808_s1 }
  0x17   :  { %p4208_p10 = pnand %p4206_p9, %p4203_p8 }
  0x19   :  { %4211 = shalt.err (!%p4208_p10)
}
  0x1a   :  { %s4212_s23 = scalar_lea.vmem %s4344_s20, 384  ;;  %p4217_p12 = scmp.lt.s32.totalorder %s4344_s20, %s4344_s20 }
  0x1b   :  { %p4213_p11 = scmp.ne.s32.totalorder %s4344_s20, %s4212_s23  ;;  %p4218_p13 = scmp.lt.s32.totalorder %s4212_s23, %s4212_s23 }
  0x1d   :  { %p4219_p0 = por %p4218_p13, %p4217_p12 }
  0x1f   :  { %p4220_p1 = pnand %p4219_p0, %p4213_p11 }
  0x21   :  { %4223 = shalt.err (!%p4220_p1)
}
  0x22   :  { %33 = dma.hbm_to_vmem [thread:$0]  %s5808_s1, 384, %s4344_s20, [#allocation3], %s4276_s29, %s4276_s29, %s4277_s30  }
  0x23   :  { %s4278_s24 = smov [#allocation7]   ;;  %s4224_s28 = scalar_lea.hbm %s5810_s3, 384 }
  0x24   :  { %s52_s25 = sshll.u32 %s4278_s24, 4  ;;  %p4225_p2 = scmp.ne.s32.totalorder %s5810_s3, %s4224_s28  ;;  %s53_s25 = int_to_ptr.vmem [resolvable:$true] %s52_s25 }
  0x25   :  { %p4228_p3 = scmp.lt.u32.totalorder %s4224_s28, %s5810_s3 }
  0x27   :  { %p4230_p4 = pnand %p4228_p3, %p4225_p2 }
  0x29   :  { %4233 = shalt.err (!%p4230_p4)
}
  0x2a   :  { %s4234_s16 = scalar_lea.vmem %s53_s25, 384  ;;  %p4239_p6 = scmp.lt.s32.totalorder %s53_s25, %s53_s25 }
  0x2b   :  { %p4235_p5 = scmp.ne.s32.totalorder %s53_s25, %s4234_s16  ;;  %p4240_p7 = scmp.lt.s32.totalorder %s4234_s16, %s4234_s16 }
  0x2d   :  { %p4241_p8 = por %p4240_p7, %p4239_p6 }
  0x2f   :  { %p4242_p9 = pnand %p4241_p8, %p4235_p5 }
  0x31   :  { %4245 = shalt.err (!%p4242_p9)
}
  0x32   :  { %55 = dma.hbm_to_vmem [thread:$0]  %s5810_s3, 384, %s53_s25, [#allocation6]  }
  0x33   :  { %4268 = dma.done.wait [#allocation3], 384  }
  0x34   :  { %4269 = vsyncadd [#allocation3], 4294966912 }
  0x35   :  { %4270 = dma.done.wait [#allocation6], 896  }
  0x36   :  { %4271 = vsyncadd [#allocation6], 4294966400  ;;  %v4279_v0 = vmov 0.0|0.0   ;;  %v4280_v1 = vmov 0.0   ;;  %v4281_v2 = vmov 0   ;;  %v77_v3 = vld [vmem:[%s5807_s0] sm:$0xff] }
  0x37   :  { %3300 = vmatprep.subr.bf16.mxu0 %v4279_v0  ;;  %170 = vmatprep.mubr.f32.mxu0 %v4280_v1  ;;  %v78_v4 = vld [vmem:[%s5807_s0 + $0x8] sm:$0xff]  ;;  %v79_v5 = vld [vmem:[%s5807_s0 + $0x10] sm:$0xff]  ;;  %v3302_v6 = vpack.c.bf16 %v77_v3, %v4280_v1  ;;  %v80_v8 = vld [vmem:[%s5807_s0 + $0x18] sm:$0xff]  ;;  %vm96_vm0 = vcmask 588800   ;;  %vm954_vm1 = vcmask 982016   ;;  %vm1922_vm2 = vcmask 261120  }
  0x38   :  { %3301 = vmatpush1.bf16.msra.mxu0 %v4279_v0  ;;  %253 = vmatprep.mubr.f32.mxu1 %v4280_v1  ;;  %v3305_v7 = vpack.c.bf16 %v79_v5, %v78_v4  ;;  %v81_v9 = vld [vmem:[%s5807_s0 + $0x20] sm:$0xff]  ;;  %v3307_v10 = vpack.c.bf16 %v78_v4, %v77_v3  ;;  %v82_v12 = vld [vmem:[%s5807_s0 + $0x28] sm:$0xff]  ;;  %v83_v13 = vld [vmem:[%s5807_s0 + $0x30] sm:$0xff]  ;;  %v3311_v16 = vpack.c.bf16 %v80_v8, %v79_v5  ;;  %vm4282_vm3 = vmmov 0  }
  0x39   :  { %4178 = vset.pattern.permute.xlu1 %v4281_v2  ;;  %4177 = vset.pattern.permute.xlu0 %v4281_v2  ;;  %v3309_v11 = vpack.c.bf16 %v81_v9, %v80_v8  ;;  %v819_v14 = vld [vmem:[%s5811_s4 + $0x8] sm:$0xff]  ;;  %v818_v15 = vld [vmem:[%s5811_s4] sm:$0xff]  ;;  %v820_v17 = vld [vmem:[%s5811_s4 + $0x10] sm:$0xff]  ;;  %v4427_v19 = vpack.c.bf16 %v83_v13, %v82_v12  ;;  %v4429_v20 = vpack.c.bf16 %v82_v12, %v81_v9 }
  0x3a   :  { %3303 = vmatprep.subr.bf16.mxu0 %v3302_v6  ;;  %3314 = vmatprep.subr.bf16.mxu1 %v3302_v6  ;;  %v884_v18 = vld [vmem:[%s5812_s5] sm:$0xff]  ;;  %v886_v21 = vld [vmem:[%s5812_s5 + $0x10] sm:$0xff]  ;;  %v885_v22 = vld [vmem:[%s5812_s5 + $0x8] sm:$0xff] }
  0x3b   :  { %3315 = vmatpush1.bf16.msra.mxu1 %v4279_v0  ;;  %828 = vperm.xlu1 %4178, %v819_v14   ;;  %v4438_v23 = vld [vmem:[#allocation2] sm:$0xff]  ;;  %v84_v24 = vld [vmem:[%s5807_s0 + $0x38] sm:$0xff]  ;;  %v1744_v25 = vld [vmem:[%s5813_s6 + $0x8] sm:$0xff] }
  0x3c   :  { %3304 = vmatpush1.bf16.msra.mxu0 %v4279_v0  ;;  %3317 = vmatprep.subr.bf16.mxu1 %v3305_v7  ;;  %v4449_v26 = vld [vmem:[#allocation2 + $0x8] sm:$0xff]  ;;  %v85_v27 = vld [vmem:[%s5807_s0 + $0x40] sm:$0xff]  ;;  %v4459_v28 = vld [vmem:[#allocation2 + $0x10] sm:$0xff]  ;;  %v3342_v32 = vpack.c.bf16 %v84_v24, %v83_v13 }
  0x3d   :  { %3306 = vmatprep.subr.bf16.mxu0 %v3305_v7  ;;  %823 = vperm.xlu0 %4177, %v818_v15   ;;  %v3340_v29 = vpack.c.bf16 %v85_v27, %v84_v24  ;;  %v86_v30 = vld [vmem:[%s5807_s0 + $0x48] sm:$0xff]  ;;  %v87_v31 = vld [vmem:[%s5807_s0 + $0x50] sm:$0xff]  ;;  %v1743_v34 = vld [vmem:[%s5813_s6] sm:$0xff] }
  0x3e   :  { %v4478_v33 = vpack.c.bf16 %v87_v31, %v86_v30  ;;  %v1832_v35 = vld [vmem:[%s5814_s7 + $0x8] sm:$0xff]  ;;  %v3358_v36 = vpack.c.bf16 %v86_v30, %v85_v27  ;;  %v88_v37 = vld [vmem:[%s5807_s0 + $0x58] sm:$0xff]  ;;  %v1831_v38 = vld [vmem:[%s5814_s7] sm:$0xff] }
  0x3f   :  { %3319 = vmatpush1.bf16.msra.mxu1 %v3307_v10  ;;  %833 = vperm.xlu1 %4178, %v820_v17   ;;  %v89_v39 = vld [vmem:[%s5807_s0 + $0x60] sm:$0xff]  ;;  %v90_v41 = vld [vmem:[%s5807_s0 + $0x68] sm:$0xff]  ;;  %v91_v42 = vld [vmem:[%s5807_s0 + $0x70] sm:$0xff]  ;;  %v3374_v43 = vpack.c.bf16 %v88_v37, %v87_v31 }
  0x40   :  { %3308 = vmatpush1.bf16.msra.mxu0 %v3307_v10  ;;  %3321 = vmatprep.subr.bf16.mxu1 %v3309_v11  ;;  %v3372_v40 = vpack.c.bf16 %v89_v39, %v88_v37  ;;  %v1746_v44 = vld [vmem:[%s5813_s6 + $0x18] sm:$0xff]  ;;  %v3388_v45 = vpack.c.bf16 %v91_v42, %v90_v41  ;;  %v1745_v46 = vld [vmem:[%s5813_s6 + $0x10] sm:$0xff]  ;;  %v3390_v47 = vpack.c.bf16 %v90_v41, %v89_v39  ;;  %v3100_v53 = vld [vmem:[%s5816_s9] sm:$0xff] }
  0x41   :  { %3310 = vmatprep.subr.bf16.mxu0 %v3309_v11  ;;  %889 = vperm.xlu0 %4177, %v884_v18   ;;  %v1834_v48 = vld [vmem:[%s5814_s7 + $0x18] sm:$0xff]  ;;  %v1833_v50 = vld [vmem:[%s5814_s7 + $0x10] sm:$0xff]  ;;  %v3078_v54 = vld [vmem:[%s5815_s8] sm:$0xff] }
  0x42   :  { %v92_v49 = vld [vmem:[%s5807_s0 + $0x78] sm:$0xff] }
  0x43   :  { %3323 = vmatpush1.bf16.msra.mxu1 %v3311_v16  ;;  %899 = vperm.xlu1 %4178, %v886_v21   ;;  %v3404_v51 = vpack.c.bf16 %v4280_v1, %v92_v49  ;;  %v3406_v52 = vpack.c.bf16 %v92_v49, %v91_v42 }
  0x44   :  { %3312 = vmatpush1.bf16.msra.mxu0 %v3311_v16  ;;  %3325 = vmatprep.subr.bf16.mxu1 %v4427_v19 }
  0x45   :  { %122 = vmatprep.subr.mxu0 %v82_v12  ;;  %894 = vperm.xlu0 %4177, %v885_v22  }
  0x47   :  { %3327 = vmatpush1.bf16.msra.mxu1 %v4429_v20  ;;  %1754 = vperm.xlu1 %4178, %v1744_v25  }
  0x48   :  { %123 = vmatpush1.msra.mxu0 %v81_v9  ;;  %205 = vmatprep.subr.mxu1 %v84_v24 }
  0x49   :  { %3222 = vmatmul.mubr.msk.f32.vlgmr.msra.gmra.mrb[0].mxu0 %vm96_vm0, %v4438_v23  ;;  %3329 = vmatprep.subr.bf16.mxu0 %v3305_v7 }
  0x4a   :  { %3331 = vmatpush1.bf16.msra.mxu0 %v3307_v10  ;;  %176 = vmatprep.mubr.f32.mxu0 %v4280_v1 }
  0x4b   :  { %3333 = vmatprep.subr.bf16.mxu0 %v3309_v11  ;;  %206 = vmatpush1.msra.mxu1 %v83_v13 }
  0x4c   :  { %3225 = vmatmul.mubr.msk.f32.vlgmr.msra.gmra.mrb[0].mxu1 %vm96_vm0, %v4438_v23  ;;  %3345 = vmatprep.subr.bf16.mxu1 %v3309_v11 }
  0x4d   :  { %3223 = vmatmul.mubr.msk.f32.gmra.mrb[2].mxu0 %vm96_vm0, %v4449_v26  ;;  %3347 = vmatpush1.bf16.msra.mxu1 %v3311_v16 }
  0x4e   :  { %3335 = vmatpush1.bf16.msra.mxu0 %v3311_v16  ;;  %182 = vmatprep.mubr.f32.mxu0 %v4280_v1 }
  0x4f   :  { %259 = vmatprep.mubr.f32.mxu1 %v4280_v1  ;;  %3337 = vmatprep.subr.bf16.mxu0 %v4427_v19 }
  0x50   :  { %3226 = vmatmul.mubr.msk.f32.gmra.mrb[2].mxu1 %vm96_vm0, %v4449_v26  ;;  %3349 = vmatprep.subr.bf16.mxu1 %v4427_v19 }
  0x51   :  { %3224 = vmatmul.mubr.msk.f32.gmra.mrb[4].mxu0 %vm96_vm0, %v4459_v28  ;;  %3351 = vmatpush1.bf16.msra.mxu1 %v4429_v20 }
  0x52   :  { %3339 = vmatpush1.bf16.msra.mxu0 %v4429_v20  ;;  %265 = vmatprep.mubr.f32.mxu1 %v4280_v1 }
  0x53   :  { %3341 = vmatprep.subr.bf16.mxu0 %v3340_v29  ;;  %3353 = vmatprep.subr.bf16.mxu1 %v3340_v29 }
  0x54   :  { %3227 = vmatmul.mubr.msk.f32.gmra.mrb[4].mxu1 %vm96_vm0, %v4459_v28  ;;  %336 = vmatprep.mubr.f32.mxu0 %v4280_v1 }
  0x55   :  { %419 = vmatprep.mubr.f32.mxu1 %v4280_v1  ;;  %3355 = vmatpush1.bf16.msra.mxu1 %v3342_v32 }
  0x56   :  { %3343 = vmatpush1.bf16.msra.mxu0 %v3342_v32  ;;  %3357 = vmatprep.subr.bf16.mxu1 %v4478_v33 }
  0x57   :  { %288 = vmatprep.subr.mxu0 %v86_v30  ;;  %1749 = vperm.xlu0 %4177, %v1743_v34  }
  0x58   :  { %1842 = vperm.xlu1 %4178, %v1832_v35  }
  0x59   :  { %3359 = vmatpush1.bf16.msra.mxu1 %v3358_v36 }
  0x5a   :  { %289 = vmatpush1.msra.mxu0 %v85_v27  ;;  %371 = vmatprep.subr.mxu1 %v88_v37 }
  0x5b   :  { %3228 = vmatmul.mubr.msk.f32.vlgmr.msra.gmra.mrb[6].mxu0 %vm96_vm0, %v4438_v23  ;;  %3361 = vmatprep.subr.bf16.mxu0 %v4427_v19 }
  0x5c   :  { %3363 = vmatpush1.bf16.msra.mxu0 %v4429_v20  ;;  %342 = vmatprep.mubr.f32.mxu0 %v4280_v1 }
  0x5d   :  { %3365 = vmatprep.subr.bf16.mxu0 %v3340_v29  ;;  %1837 = vperm.xlu0 %4177, %v1831_v38  }
  0x5e   :  { %372 = vmatpush1.msra.mxu1 %v87_v31  ;;  %1764 = vperm.xlu1 %4178, %v1746_v44  }
  0x5f   :  { %3229 = vmatmul.mubr.msk.f32.gmra.mrb[8].mxu0 %vm96_vm0, %v4449_v26  ;;  %3231 = vmatmul.mubr.msk.f32.vlgmr.msra.gmra.mrb[6].mxu1 %vm96_vm0, %v4438_v23 }
  0x60   :  { %3377 = vmatprep.subr.bf16.mxu1 %v3340_v29  ;;  %3367 = vmatpush1.bf16.msra.mxu0 %v3342_v32 }
  0x61   :  { %3379 = vmatpush1.bf16.msra.mxu1 %v3342_v32  ;;  %348 = vmatprep.mubr.f32.mxu0 %v4280_v1 }
  0x62   :  { %425 = vmatprep.mubr.f32.mxu1 %v4280_v1  ;;  %3369 = vmatprep.subr.bf16.mxu0 %v4478_v33 }
  0x63   :  { %3230 = vmatmul.mubr.msk.f32.gmra.mrb[10].mxu0 %vm96_vm0, %v4459_v28  ;;  %3232 = vmatmul.mubr.msk.f32.gmra.mrb[8].mxu1 %vm96_vm0, %v4449_v26 }
  0x64   :  { %3381 = vmatprep.subr.bf16.mxu1 %v4478_v33  ;;  %3371 = vmatpush1.bf16.msra.mxu0 %v3358_v36 }
  0x65   :  { %3383 = vmatpush1.bf16.msra.mxu1 %v3358_v36  ;;  %431 = vmatprep.mubr.f32.mxu1 %v4280_v1 }
  0x66   :  { %3373 = vmatprep.subr.bf16.mxu0 %v3372_v40  ;;  %3385 = vmatprep.subr.bf16.mxu1 %v3372_v40 }
  0x67   :  { %502 = vmatprep.mubr.f32.mxu0 %v4280_v1  ;;  %3233 = vmatmul.mubr.msk.f32.gmra.mrb[10].mxu1 %vm96_vm0, %v4459_v28 }
  0x68   :  { %3375 = vmatpush1.bf16.msra.mxu0 %v3374_v43  ;;  %585 = vmatprep.mubr.f32.mxu1 %v4280_v1 }
  0x69   :  { %3387 = vmatpush1.bf16.msra.mxu1 %v3374_v43  ;;  %454 = vmatprep.subr.mxu0 %v90_v41 }
  0x6a   :  { %3389 = vmatprep.subr.bf16.mxu1 %v3388_v45  ;;  %1759 = vperm.xlu0 %4177, %v1745_v46  }
  0x6b   :  { %1852 = vperm.xlu1 %4178, %v1834_v48  }
  0x6c   :  { %455 = vmatpush1.msra.mxu0 %v89_v39 }
  0x6d   :  { %3391 = vmatpush1.bf16.msra.mxu1 %v3390_v47  ;;  %3234 = vmatmul.mubr.msk.f32.vlgmr.msra.gmra.mrb[12].mxu0 %vm96_vm0, %v4438_v23 }
  0x6e   :  { %3393 = vmatprep.subr.bf16.mxu0 %v4478_v33  ;;  %537 = vmatprep.subr.mxu1 %v92_v49 }
  0x6f   :  { %3395 = vmatpush1.bf16.msra.mxu0 %v3358_v36  ;;  %508 = vmatprep.mubr.f32.mxu0 %v4280_v1 }
  0x70   :  { %3397 = vmatprep.subr.bf16.mxu0 %v3372_v40  ;;  %1847 = vperm.xlu0 %4177, %v1833_v50  }
  0x71   :  { %538 = vmatpush1.msra.mxu1 %v91_v42  ;;  %3235 = vmatmul.mubr.msk.f32.gmra.mrb[14].mxu0 %vm96_vm0, %v4449_v26 }
  0x72   :  { %3237 = vmatmul.mubr.msk.f32.vlgmr.msra.gmra.mrb[12].mxu1 %vm96_vm0, %v4438_v23  ;;  %3409 = vmatprep.subr.bf16.mxu1 %v3372_v40 }
  0x73   :  { %3399 = vmatpush1.bf16.msra.mxu0 %v3374_v43  ;;  %3411 = vmatpush1.bf16.msra.mxu1 %v3374_v43 }
  0x74   :  { %514 = vmatprep.mubr.f32.mxu0 %v4280_v1  ;;  %591 = vmatprep.mubr.f32.mxu1 %v4280_v1 }
  0x75   :  { %3401 = vmatprep.subr.bf16.mxu0 %v3388_v45  ;;  %3236 = vmatmul.mubr.msk.f32.gmra.mrb[16].mxu0 %vm96_vm0, %v4459_v28 }
  0x76   :  { %3238 = vmatmul.mubr.msk.f32.gmra.mrb[14].mxu1 %vm96_vm0, %v4449_v26  ;;  %3413 = vmatprep.subr.bf16.mxu1 %v3388_v45 }
  0x77   :  { %3403 = vmatpush1.bf16.msra.mxu0 %v3390_v47  ;;  %3415 = vmatpush1.bf16.msra.mxu1 %v3390_v47 }
  0x78   :  { %597 = vmatprep.mubr.f32.mxu1 %v4280_v1  ;;  %3405 = vmatprep.subr.bf16.mxu0 %v3404_v51 }
  0x79   :  { %3417 = vmatprep.subr.bf16.mxu1 %v3404_v51  ;;  %668 = vmatprep.mubr.f32.mxu0 %v4280_v1 }
  0x7a   :  { %3239 = vmatmul.mubr.msk.f32.gmra.mrb[16].mxu1 %vm96_vm0, %v4459_v28  ;;  %3103 = vperm.xlu1 %4178, %v3100_v53  }
  0x7b   :  { %3407 = vmatpush1.bf16.msra.mxu0 %v3406_v52  ;;  %751 = vmatprep.mubr.f32.mxu1 %v4280_v1 }
  0x7c   :  { %3419 = vmatpush1.bf16.msra.mxu1 %v3406_v52  ;;  %3081 = vperm.xlu0 %4177, %v3078_v54  }
  0x7d   :  { %3420 = vmatprep.subr.bf16.mxu1 %v4279_v0 }
  0x7e   :  { %3240 = vmatmul.mubr.msk.f32.vlgmr.msra.gmra.mrb[18].mxu0 %vm96_vm0, %v4438_v23 }
  0x7f   :  { %3243 = vmatmul.mubr.msk.f32.vlgmr.msra.gmra.mrb[18].mxu1 %vm96_vm0, %v4438_v23  ;;  %674 = vmatprep.mubr.f32.mxu0 %v4280_v1 }
  0x80   :  { %757 = vmatprep.mubr.f32.mxu1 %v4280_v1  ;;  %3421 = vmatpush1.bf16.msra.mxu1 %v4279_v0 }
  0x82   :  { %3241 = vmatmul.mubr.msk.f32.gmra.mrb[20].mxu0 %vm96_vm0, %v4449_v26 }
  0x83   :  { %3244 = vmatmul.mubr.msk.f32.gmra.mrb[20].mxu1 %vm96_vm0, %v4449_v26  ;;  %680 = vmatprep.mubr.f32.mxu0 %v4280_v1 }
  0x84   :  { %763 = vmatprep.mubr.f32.mxu1 %v4280_v1 }
  0x86   :  { %3242 = vmatmul.mubr.msk.f32.gmra.mrb[22].mxu0 %vm96_vm0, %v4459_v28 }
  0x87   :  { %3245 = vmatmul.mubr.msk.f32.gmra.mrb[22].mxu1 %vm96_vm0, %v4459_v28  ;;  %1120 = vmatprep.mubr.f32.mxu0 %v4280_v1 }
  0x88   :  { %1031 = vmatprep.mubr.f32.mxu1 %v4280_v1 }
  0xba   :  { %v4591_v56 = vpop.permute.xlu1 %828 }
  0xbc   :  { %v4589_v55 = vpop.permute.xlu0 %823 }
  0xbe   :  { %v4598_v9 = vpop.permute.xlu1 %833 }
  0xc0   :  { %v4593_v58 = vpop.permute.xlu0 %889 }
  0xc2   :  { %v4613_v32 = vpop.permute.xlu1 %899 }
  0xc4   :  { %v4600_v12 = vpop.permute.xlu0 %894 }
 0x11c   :  { %v172_v57 = vpop.f32.mrb[0].mxu0 }
 0x11d   :  { %v770_v59 = vmax.f32 %v172_v57, 0.0  ;;  %v174_v60 = vpop.f32.mrb[1].mxu0 }
 0x11e   :  { %v771_v61 = vmax.f32 %v174_v60, 0.0 }
 0x11f   :  { %v836_v62 = vmul.f32 %v4589_v55, %v770_v59  ;;  %v255_v3 = vpop.f32.mrb[0].mxu1 }
 0x120   :  { %v837_v63 = vmul.f32 %v4589_v55, %v771_v61  ;;  %v178_v2 = vpop.f32.mrb[2].mxu0  ;;  %v772_v6 = vmax.f32 %v255_v3, 0.0  ;;  %v257_v8 = vpop.f32.mrb[1].mxu1 }
 0x121   :  { %v902_v4 = vadd.f32 %v4593_v58, %v836_v62  ;;  %v786_v5 = vmax.f32 %v178_v2, 0.0  ;;  %v180_v7 = vpop.f32.mrb[3].mxu0  ;;  %v773_v11 = vmax.f32 %v257_v8, 0.0 }
 0x122   :  { %v787_v10 = vmax.f32 %v180_v7, 0.0  ;;  %v903_v15 = vadd.f32 %v4593_v58, %v837_v63  ;;  %v838_v20 = vmul.f32 %v4589_v55, %v772_v6 }
 0x123   :  { %v852_v13 = vmul.f32 %v4591_v56, %v786_v5  ;;  %v3422_v14 = vpack.c.bf16 %v902_v4, %v4280_v1  ;;  %v261_v18 = vpop.f32.mrb[2].mxu1  ;;  %v839_v26 = vmul.f32 %v4589_v55, %v773_v11 }
 0x124   :  { %v853_v16 = vmul.f32 %v4591_v56, %v787_v10  ;;  %v184_v17 = vpop.f32.mrb[4].mxu0  ;;  %v788_v22 = vmax.f32 %v261_v18, 0.0  ;;  %v263_v24 = vpop.f32.mrb[3].mxu1  ;;  %v904_v37 = vadd.f32 %v4593_v58, %v838_v20 }
 0x125   :  { %v918_v19 = vadd.f32 %v4600_v12, %v852_v13  ;;  %v802_v21 = vmax.f32 %v184_v17, 0.0  ;;  %v186_v23 = vpop.f32.mrb[5].mxu0  ;;  %3423 = vmatprep.subr.bf16.mxu1 %v3422_v14  ;;  %v789_v28 = vmax.f32 %v263_v24, 0.0  ;;  %v905_v42 = vadd.f32 %v4593_v58, %v839_v26 }
 0x126   :  { %v919_v25 = vadd.f32 %v4600_v12, %v853_v16  ;;  %v803_v27 = vmax.f32 %v186_v23, 0.0  ;;  %3424 = vmatpush1.bf16.msra.mxu1 %v4279_v0  ;;  %v854_v31 = vmul.f32 %v4591_v56, %v788_v22 }
 0x127   :  { %v3430_v29 = vpack.c.bf16 %v918_v19, %v902_v4  ;;  %v868_v30 = vmul.f32 %v4598_v9, %v802_v21  ;;  %v855_v34 = vmul.f32 %v4591_v56, %v789_v28  ;;  %v267_v35 = vpop.f32.mrb[4].mxu1 }
 0x128   :  { %v869_v33 = vmul.f32 %v4598_v9, %v803_v27  ;;  %v3428_v36 = vpack.c.bf16 %v919_v25, %v903_v15  ;;  %v920_v39 = vadd.f32 %v4600_v12, %v854_v31  ;;  %v804_v40 = vmax.f32 %v267_v35, 0.0  ;;  %v269_v41 = vpop.f32.mrb[5].mxu1 }
 0x129   :  { %v934_v38 = vadd.f32 %v4613_v32, %v868_v30  ;;  %v921_v44 = vadd.f32 %v4600_v12, %v855_v34  ;;  %v805_v45 = vmax.f32 %v269_v41, 0.0 }
 0x12a   :  { %v935_v43 = vadd.f32 %v4613_v32, %v869_v33  ;;  %3445 = vmatprep.subr.bf16.mxu0 %v3428_v36  ;;  %v4623_v47 = vpack.c.bf16 %v920_v39, %v904_v37  ;;  %v870_v48 = vmul.f32 %v4598_v9, %v804_v40 }
 0x12b   :  { %v3434_v46 = vpack.c.bf16 %v903_v15, %v934_v38  ;;  %3447 = vmatpush1.bf16.msra.mxu0 %v3430_v29  ;;  %v3425_v49 = vpack.c.bf16 %v934_v38, %v918_v19  ;;  %v871_v51 = vmul.f32 %v4598_v9, %v805_v45  ;;  %v4627_v53 = vpack.c.bf16 %v921_v44, %v905_v42 }
 0x12c   :  { %v3438_v50 = vpack.c.bf16 %v935_v43, %v919_v25  ;;  %v3432_v52 = vpack.c.bf16 %v904_v37, %v935_v43  ;;  %v4630_v54 = vadd.f32 %v4613_v32, %v870_v48 }
 0x12d   :  { %3426 = vmatprep.subr.bf16.mxu1 %v3425_v49  ;;  %v4633_v57 = vadd.f32 %v4613_v32, %v871_v51 }
 0x12e   :  { %v338_v59 = vpop.f32.mrb[6].mxu0  ;;  %3427 = vmatpush1.bf16.msra.mxu1 %v4279_v0  ;;  %3449 = vmatprep.subr.bf16.mxu0 %v3432_v52  ;;  %v3436_v62 = vpack.c.bf16 %v4630_v54, %v920_v39  ;;  %v4638_v63 = vpack.c.bf16 %v905_v42, %v4630_v54 }
 0x12f   :  { %v774_v60 = vmax.f32 %v338_v59, 0.0  ;;  %v340_v61 = vpop.f32.mrb[7].mxu0  ;;  %3429 = vmatprep.subr.bf16.mxu1 %v3428_v36  ;;  %3451 = vmatpush1.bf16.msra.mxu0 %v3434_v46  ;;  %v4641_v3 = vpack.c.bf16 %v4633_v57, %v921_v44 }
 0x130   :  { %v775_v2 = vmax.f32 %v340_v61, 0.0  ;;  %3453 = vmatprep.subr.bf16.mxu0 %v3436_v62 }
 0x131   :  { %v840_v4 = vmul.f32 %v4589_v55, %v774_v60 }
 0x132   :  { %v344_v5 = vpop.f32.mrb[8].mxu0  ;;  %3431 = vmatpush1.bf16.msra.mxu1 %v3430_v29  ;;  %v841_v7 = vmul.f32 %v4589_v55, %v775_v2  ;;  %v421_v10 = vpop.f32.mrb[6].mxu1 }
 0x133   :  { %v906_v6 = vadd.f32 %v4593_v58, %v840_v4  ;;  %v790_v8 = vmax.f32 %v344_v5, 0.0  ;;  %v346_v11 = vpop.f32.mrb[9].mxu0  ;;  %3433 = vmatprep.subr.bf16.mxu1 %v3432_v52  ;;  %3455 = vmatpush1.bf16.msra.mxu0 %v3438_v50  ;;  %v776_v13 = vmax.f32 %v421_v10, 0.0  ;;  %v423_v15 = vpop.f32.mrb[7].mxu1 }
 0x134   :  { %v791_v14 = vmax.f32 %v346_v11, 0.0  ;;  %3457 = vmatprep.subr.bf16.mxu0 %v4627_v53  ;;  %v777_v17 = vmax.f32 %v423_v15, 0.0  ;;  %v907_v21 = vadd.f32 %v4593_v58, %v841_v7 }
 0x135   :  { %v856_v16 = vmul.f32 %v4591_v56, %v790_v8  ;;  %v4649_v18 = vpack.c.bf16 %v906_v6, %v4633_v57  ;;  %v842_v23 = vmul.f32 %v4589_v55, %v776_v13 }
 0x136   :  { %v857_v19 = vmul.f32 %v4591_v56, %v791_v14  ;;  %v350_v20 = vpop.f32.mrb[10].mxu0  ;;  %3435 = vmatpush1.bf16.msra.mxu1 %v3434_v46  ;;  %v427_v25 = vpop.f32.mrb[8].mxu1  ;;  %v843_v28 = vmul.f32 %v4589_v55, %v777_v17 }
 0x137   :  { %v922_v22 = vadd.f32 %v4600_v12, %v856_v16  ;;  %v806_v24 = vmax.f32 %v350_v20, 0.0  ;;  %v352_v26 = vpop.f32.mrb[11].mxu0  ;;  %3437 = vmatprep.subr.bf16.mxu1 %v3436_v62  ;;  %3459 = vmatpush1.bf16.msra.mxu0 %v4623_v47  ;;  %v792_v29 = vmax.f32 %v427_v25, 0.0  ;;  %v429_v31 = vpop.f32.mrb[9].mxu1  ;;  %v908_v39 = vadd.f32 %v4593_v58, %v842_v23 }
 0x138   :  { %v923_v27 = vadd.f32 %v4600_v12, %v857_v19  ;;  %v807_v30 = vmax.f32 %v352_v26, 0.0  ;;  %3461 = vmatprep.subr.bf16.mxu0 %v4649_v18  ;;  %v793_v35 = vmax.f32 %v429_v31, 0.0  ;;  %v909_v43 = vadd.f32 %v4593_v58, %v843_v28 }
 0x139   :  { %v4659_v33 = vpack.c.bf16 %v922_v22, %v906_v6  ;;  %v872_v34 = vmul.f32 %v4598_v9, %v806_v24  ;;  %v858_v36 = vmul.f32 %v4591_v56, %v792_v29  ;;  %v4693_v6 = vld [vmem:[#allocation5] sm:$0xff] }
 0x13a   :  { %v873_v37 = vmul.f32 %v4598_v9, %v807_v30  ;;  %3439 = vmatpush1.bf16.msra.mxu1 %v3438_v50  ;;  %v4664_v38 = vpack.c.bf16 %v923_v27, %v907_v21  ;;  %v859_v41 = vmul.f32 %v4591_v56, %v793_v35  ;;  %v433_v42 = vpop.f32.mrb[10].mxu1 }
 0x13b   :  { %v938_v40 = vadd.f32 %v4613_v32, %v872_v34  ;;  %3441 = vmatprep.subr.bf16.mxu1 %v4627_v53  ;;  %3463 = vmatpush1.bf16.msra.mxu0 %v4638_v63  ;;  %v924_v44 = vadd.f32 %v4600_v12, %v858_v36  ;;  %v808_v45 = vmax.f32 %v433_v42, 0.0  ;;  %v435_v46 = vpop.f32.mrb[11].mxu1 }
 0x13c   :  { %v939_v48 = vadd.f32 %v4613_v32, %v873_v37  ;;  %v925_v49 = vadd.f32 %v4600_v12, %v859_v41  ;;  %v809_v50 = vmax.f32 %v435_v46, 0.0 }
 0x13d   :  { %v3464_v51 = vpack.c.bf16 %v938_v40, %v922_v22  ;;  %v4675_v52 = vpack.c.bf16 %v907_v21, %v938_v40  ;;  %v4677_v59 = vpack.c.bf16 %v924_v44, %v908_v39  ;;  %v874_v60 = vmul.f32 %v4598_v9, %v808_v45 }
 0x13e   :  { %3443 = vmatpush1.bf16.msra.mxu1 %v4623_v47  ;;  %v4681_v61 = vpack.c.bf16 %v908_v39, %v939_v48  ;;  %v4683_v62 = vpack.c.bf16 %v939_v48, %v923_v27  ;;  %v875_v2 = vmul.f32 %v4598_v9, %v809_v50  ;;  %v4687_v4 = vpack.c.bf16 %v925_v49, %v909_v43  ;;  %v4725_v27 = vld [vmem:[#allocation5 + $0x10] sm:$0xff] }
 0x13f   :  { %995 = vmatprep.subr.mxu1 %v4633_v57  ;;  %3465 = vmatprep.subr.bf16.mxu0 %v3464_v51  ;;  %v4690_v5 = vadd.f32 %v4613_v32, %v874_v60 }
 0x140   :  { %3467 = vmatpush1.bf16.msra.mxu0 %v4641_v3  ;;  %v4696_v7 = vadd.f32 %v4613_v32, %v875_v2  ;;  %v504_v8 = vpop.f32.mrb[12].mxu0 }
 0x141   :  { %3469 = vmatprep.subr.bf16.mxu0 %v4664_v38  ;;  %v778_v10 = vmax.f32 %v504_v8, 0.0  ;;  %v506_v11 = vpop.f32.mrb[13].mxu0  ;;  %v4701_v57 = vpack.c.bf16 %v4690_v5, %v924_v44  ;;  %v4704_v13 = vpack.c.bf16 %v909_v43, %v4690_v5 }
 0x142   :  { %996 = vmatpush1.msra.mxu1 %v4630_v54  ;;  %v779_v14 = vmax.f32 %v506_v11, 0.0  ;;  %v4710_v15 = vpack.c.bf16 %v4696_v7, %v925_v49  ;;  %v4715_v54 = vld [vmem:[#allocation5 + $0x8] sm:$0xff] }
 0x143   :  { %3246 = vmatmul.mubr.msk.f32.vlgmr.msra.gmra.mrb[24].mxu1 %vm954_vm1, %v4693_v6  ;;  %3473 = vmatprep.subr.bf16.mxu1 %v4627_v53  ;;  %v844_v16 = vmul.f32 %v4589_v55, %v778_v10 }
 0x144   :  { %3471 = vmatpush1.bf16.msra.mxu0 %v4659_v33  ;;  %3475 = vmatpush1.bf16.msra.mxu1 %v4623_v47  ;;  %v845_v17 = vmul.f32 %v4589_v55, %v779_v14  ;;  %v510_v19 = vpop.f32.mrb[14].mxu0 }
 0x145   :  { %v587_v20 = vpop.f32.mrb[12].mxu1  ;;  %1084 = vmatprep.subr.mxu0 %v939_v48  ;;  %3477 = vmatprep.subr.bf16.mxu1 %v4649_v18  ;;  %v910_v53 = vadd.f32 %v4593_v58, %v844_v16  ;;  %v794_v21 = vmax.f32 %v510_v19, 0.0  ;;  %v512_v23 = vpop.f32.mrb[15].mxu0  ;;  %v4749_v48 = vld [vmem:[#allocation5 + $0x18] sm:$0xff] }
 0x146   :  { %v780_v22 = vmax.f32 %v587_v20, 0.0  ;;  %v589_v24 = vpop.f32.mrb[13].mxu1  ;;  %1037 = vmatprep.mubr.f32.mxu1 %v4280_v1  ;;  %v795_v25 = vmax.f32 %v512_v23, 0.0  ;;  %v911_v28 = vadd.f32 %v4593_v58, %v845_v17 }
 0x147   :  { %v781_v26 = vmax.f32 %v589_v24, 0.0  ;;  %3247 = vmatmul.mubr.msk.f32.gmra.mrb[26].mxu1 %vm954_vm1, %v4715_v54  ;;  %v860_v47 = vmul.f32 %v4591_v56, %v794_v21  ;;  %v4728_v18 = vpack.c.bf16 %v910_v53, %v4696_v7 }
 0x148   :  { %1085 = vmatpush1.msra.mxu0 %v938_v40  ;;  %3479 = vmatpush1.bf16.msra.mxu1 %v4638_v63  ;;  %v861_v29 = vmul.f32 %v4591_v56, %v795_v25  ;;  %v516_v30 = vpop.f32.mrb[16].mxu0  ;;  %v846_v35 = vmul.f32 %v4589_v55, %v780_v22 }
 0x149   :  { %v593_v31 = vpop.f32.mrb[14].mxu1  ;;  %3250 = vmatmul.mubr.msk.f32.vlgmr.msra.gmra.mrb[24].mxu0 %vm954_vm1, %v4693_v6  ;;  %3481 = vmatprep.subr.bf16.mxu1 %v3464_v51  ;;  %v926_v34 = vadd.f32 %v4600_v12, %v860_v47  ;;  %v810_v63 = vmax.f32 %v516_v30, 0.0  ;;  %v518_v37 = vpop.f32.mrb[17].mxu0  ;;  %v847_v41 = vmul.f32 %v4589_v55, %v781_v26 }
 0x14a   :  { %v796_v36 = vmax.f32 %v593_v31, 0.0  ;;  %v595_v39 = vpop.f32.mrb[15].mxu1  ;;  %3501 = vmatprep.subr.bf16.mxu0 %v4664_v38  ;;  %1043 = vmatprep.mubr.f32.mxu1 %v4280_v1  ;;  %v927_v40 = vadd.f32 %v4600_v12, %v861_v29  ;;  %v811_v42 = vmax.f32 %v518_v37, 0.0  ;;  %v912_v2 = vadd.f32 %v4593_v58, %v846_v35 }
 0x14b   :  { %v797_v43 = vmax.f32 %v595_v39, 0.0  ;;  %3503 = vmatpush1.bf16.msra.mxu0 %v4659_v33  ;;  %3248 = vmatmul.mubr.msk.f32.gmra.mrb[28].mxu1 %vm954_vm1, %v4725_v27  ;;  %v4743_v44 = vpack.c.bf16 %v926_v34, %v910_v53  ;;  %v876_v45 = vmul.f32 %v4598_v9, %v810_v63 }
 0x14c   :  { %v862_v46 = vmul.f32 %v4591_v56, %v796_v36  ;;  %3505 = vmatprep.subr.bf16.mxu0 %v4681_v61  ;;  %1126 = vmatprep.mubr.f32.mxu0 %v4280_v1  ;;  %v877_v49 = vmul.f32 %v4598_v9, %v811_v42  ;;  %v4756_v60 = vpack.c.bf16 %v927_v40, %v911_v28 }
 0x14d   :  { %v863_v50 = vmul.f32 %v4591_v56, %v797_v43  ;;  %v599_v51 = vpop.f32.mrb[16].mxu1  ;;  %3483 = vmatpush1.bf16.msra.mxu1 %v4641_v3  ;;  %3251 = vmatmul.mubr.msk.f32.gmra.mrb[26].mxu0 %vm954_vm1, %v4715_v54  ;;  %v4760_v8 = vadd.f32 %v4613_v32, %v876_v45  ;;  %v913_v3 = vadd.f32 %v4593_v58, %v847_v41 }
 0x14e   :  { %v928_v10 = vadd.f32 %v4600_v12, %v862_v46  ;;  %v812_v11 = vmax.f32 %v599_v51, 0.0  ;;  %v601_v14 = vpop.f32.mrb[17].mxu1  ;;  %3485 = vmatprep.subr.bf16.mxu1 %v4664_v38  ;;  %1049 = vmatprep.mubr.f32.mxu1 %v4280_v1  ;;  %v4771_v19 = vadd.f32 %v4613_v32, %v877_v49 }
 0x14f   :  { %v929_v16 = vadd.f32 %v4600_v12, %v863_v50  ;;  %v813_v17 = vmax.f32 %v601_v14, 0.0  ;;  %3507 = vmatpush1.bf16.msra.mxu0 %v4675_v52  ;;  %3249 = vmatmul.mubr.msk.f32.gmra.mrb[30].mxu1 %vm954_vm1, %v4749_v48  ;;  %v4779_v38 = vpack.c.bf16 %v4760_v8, %v926_v34  ;;  %v4789_v24 = vpack.c.bf16 %v911_v28, %v4760_v8 }
 0x150   :  { %v4773_v20 = vpack.c.bf16 %v928_v10, %v912_v2  ;;  %v878_v53 = vmul.f32 %v4598_v9, %v812_v11  ;;  %3509 = vmatprep.subr.bf16.mxu0 %v4701_v57  ;;  %1132 = vmatprep.mubr.f32.mxu0 %v4280_v1  ;;  %v4786_v23 = vpack.c.bf16 %v912_v2, %v4771_v19 }
 0x151   :  { %v879_v21 = vmul.f32 %v4598_v9, %v813_v17  ;;  %v670_v22 = vpop.f32.mrb[18].mxu0  ;;  %3487 = vmatpush1.bf16.msra.mxu1 %v4659_v33  ;;  %3252 = vmatmul.mubr.msk.f32.gmra.mrb[28].mxu0 %vm954_vm1, %v4725_v27  ;;  %v4797_v33 = vpack.c.bf16 %v4771_v19, %v927_v40  ;;  %v4799_v30 = vpack.c.bf16 %v929_v16, %v913_v3 }
 0x152   :  { %v4792_v25 = vadd.f32 %v4613_v32, %v878_v53  ;;  %v782_v26 = vmax.f32 %v670_v22, 0.0  ;;  %v753_v47 = vpop.f32.mrb[18].mxu1  ;;  %v672_v29 = vpop.f32.mrb[19].mxu0  ;;  %3489 = vmatprep.subr.bf16.mxu1 %v4681_v61  ;;  %1138 = vmatprep.mubr.f32.mxu0 %v4280_v1 }
 0x153   :  { %v4802_v31 = vadd.f32 %v4613_v32, %v879_v21  ;;  %v784_v28 = vmax.f32 %v753_v47, 0.0  ;;  %v783_v34 = vmax.f32 %v672_v29, 0.0  ;;  %v755_v35 = vpop.f32.mrb[19].mxu1  ;;  %3511 = vmatpush1.bf16.msra.mxu0 %v4683_v62  ;;  %1209 = vmatprep.mubr.f32.mxu1 %v4280_v1 }
 0x154   :  { %v848_v63 = vmul.f32 %v4589_v55, %v782_v26  ;;  %v785_v61 = vmax.f32 %v755_v35, 0.0  ;;  %3513 = vmatprep.subr.bf16.mxu0 %v4687_v4  ;;  %v4809_v36 = vpack.c.bf16 %v4792_v25, %v928_v10  ;;  %v4812_v37 = vpack.c.bf16 %v913_v3, %v4792_v25 }
 0x155   :  { %v850_v39 = vmul.f32 %v4589_v55, %v784_v28  ;;  %v849_v40 = vmul.f32 %v4589_v55, %v783_v34  ;;  %v676_v41 = vpop.f32.mrb[20].mxu0  ;;  %3491 = vmatpush1.bf16.msra.mxu1 %v4675_v52  ;;  %3253 = vmatmul.mubr.msk.f32.gmra.mrb[30].mxu0 %vm954_vm1, %v4749_v48  ;;  %v4820_v42 = vpack.c.bf16 %v4802_v31, %v929_v16 }
 0x156   :  { %v914_v43 = vadd.f32 %v4593_v58, %v848_v63  ;;  %v851_v45 = vmul.f32 %v4589_v55, %v785_v61  ;;  %v798_v46 = vmax.f32 %v676_v41, 0.0  ;;  %v759_v49 = vpop.f32.mrb[20].mxu1  ;;  %v678_v50 = vpop.f32.mrb[21].mxu0  ;;  %3493 = vmatprep.subr.bf16.mxu1 %v4701_v57  ;;  %1298 = vmatprep.mubr.f32.mxu0 %v4280_v1 }
 0x157   :  { %v800_v51 = vmax.f32 %v759_v49, 0.0  ;;  %v799_v2 = vmax.f32 %v678_v50, 0.0  ;;  %v761_v52 = vpop.f32.mrb[21].mxu1  ;;  %3515 = vmatpush1.bf16.msra.mxu0 %v4677_v59  ;;  %v916_v55 = vadd.f32 %v4593_v58, %v850_v39  ;;  %v915_v3 = vadd.f32 %v4593_v58, %v849_v40 }
 0x158   :  { %v864_v10 = vmul.f32 %v4591_v56, %v798_v46  ;;  %v801_v11 = vmax.f32 %v761_v52, 0.0  ;;  %3517 = vmatprep.subr.bf16.mxu0 %v4728_v18  ;;  %v4830_v14 = vpack.c.bf16 %v914_v43, %v4802_v31  ;;  %v4838_v53 = vadd.f32 %v4593_v58, %v851_v45 }
 0x159   :  { %v866_v57 = vmul.f32 %v4591_v56, %v800_v51  ;;  %v865_v16 = vmul.f32 %v4591_v56, %v799_v2  ;;  %v682_v17 = vpop.f32.mrb[22].mxu0  ;;  %3495 = vmatpush1.bf16.msra.mxu1 %v4683_v62 }
 0x15a   :  { %v930_v21 = vadd.f32 %v4600_v12, %v864_v10  ;;  %v867_v22 = vmul.f32 %v4591_v56, %v801_v11  ;;  %v814_v26 = vmax.f32 %v682_v17, 0.0  ;;  %v765_v47 = vpop.f32.mrb[22].mxu1  ;;  %v684_v29 = vpop.f32.mrb[23].mxu0  ;;  %3497 = vmatprep.subr.bf16.mxu1 %v4687_v4 }
 0x15b   :  { %v932_v28 = vadd.f32 %v4600_v12, %v866_v57  ;;  %v931_v34 = vadd.f32 %v4600_v12, %v865_v16  ;;  %v816_v35 = vmax.f32 %v765_v47, 0.0  ;;  %v815_v63 = vmax.f32 %v684_v29, 0.0  ;;  %v767_v61 = vpop.f32.mrb[23].mxu1  ;;  %3519 = vmatpush1.bf16.msra.mxu0 %v4704_v13 }
 0x15c   :  { %v4846_v58 = vpack.c.bf16 %v930_v21, %v914_v43  ;;  %v4849_v62 = vadd.f32 %v4600_v12, %v867_v22  ;;  %v880_v56 = vmul.f32 %v4598_v9, %v814_v26  ;;  %v817_v39 = vmax.f32 %v767_v61, 0.0  ;;  %3521 = vmatprep.subr.bf16.mxu0 %v4779_v38 }
 0x15d   :  { %v4853_v40 = vpack.c.bf16 %v932_v28, %v916_v55  ;;  %v882_v41 = vmul.f32 %v4598_v9, %v816_v35  ;;  %v881_v45 = vmul.f32 %v4598_v9, %v815_v63  ;;  %3499 = vmatpush1.bf16.msra.mxu1 %v4677_v59  ;;  %v4858_v46 = vpack.c.bf16 %v931_v34, %v915_v3 }
 0x15e   :  { %v4861_v43 = vadd.f32 %v4613_v32, %v880_v56  ;;  %v883_v12 = vmul.f32 %v4598_v9, %v817_v39  ;;  %1173 = vmatprep.subr.mxu1 %v4696_v7  ;;  %v4867_v49 = vpack.c.bf16 %v4849_v62, %v4838_v53 }
 0x15f   :  { %v4870_v50 = vadd.f32 %v4613_v32, %v882_v41  ;;  %3523 = vmatpush1.bf16.msra.mxu0 %v4710_v15  ;;  %v947_v51 = vadd.f32 %v4613_v32, %v881_v45 }
 0x160   :  { %v4875_v2 = vadd.f32 %v4613_v32, %v883_v12  ;;  %3525 = vmatprep.subr.bf16.mxu0 %v4756_v60  ;;  %v4879_v9 = vpack.c.bf16 %v4861_v43, %v930_v21  ;;  %v4882_v7 = vpack.c.bf16 %v915_v3, %v4861_v43 }
 0x161   :  { %1174 = vmatpush1.msra.mxu1 %v4690_v5  ;;  %v4885_v52 = vpack.c.bf16 %v916_v55, %v947_v51  ;;  %v4888_v10 = vpack.c.bf16 %v4870_v50, %v932_v28  ;;  %v4890_v11 = vpack.c.bf16 %v947_v51, %v931_v34  ;;  %v3630_v32 = vpack.c.bf16 %v4838_v53, %v4870_v50  ;;  %v5053_v5 = vpop.permute.xlu1 %1754 }
 0x162   :  { %3254 = vmatmul.mubr.msk.f32.vlgmr.msra.gmra.mrb[32].mxu1 %vm954_vm1, %v4693_v6  ;;  %3529 = vmatprep.subr.bf16.mxu1 %v4687_v4  ;;  %v3633_v3 = vpack.c.bf16 %v4875_v2, %v4849_v62  ;;  %v5049_v4 = vld [vmem:[#allocation7 + $0x8] sm:$0xff] }
 0x163   :  { %3527 = vmatpush1.bf16.msra.mxu0 %v4743_v44  ;;  %3531 = vmatpush1.bf16.msra.mxu1 %v4677_v59  ;;  %v3628_v59 = vpack.c.bf16 %v4280_v1, %v4875_v2 }
 0x164   :  { %1262 = vmatprep.subr.mxu0 %v4771_v19  ;;  %3533 = vmatprep.subr.bf16.mxu1 %v4728_v18 }
 0x165   :  { %1215 = vmatprep.mubr.f32.mxu1 %v4280_v1  ;;  %v5063_v18 = vpop.permute.xlu1 %1842 }
 0x166   :  { %3255 = vmatmul.mubr.msk.f32.gmra.mrb[34].mxu1 %vm954_vm1, %v4715_v54 }
 0x167   :  { %1263 = vmatpush1.msra.mxu0 %v4760_v8  ;;  %3535 = vmatpush1.bf16.msra.mxu1 %v4704_v13 }
 0x168   :  { %3258 = vmatmul.mubr.msk.f32.vlgmr.msra.gmra.mrb[32].mxu0 %vm954_vm1, %v4693_v6  ;;  %3537 = vmatprep.subr.bf16.mxu1 %v4779_v38 }
 0x169   :  { %3557 = vmatprep.subr.bf16.mxu0 %v4756_v60  ;;  %1221 = vmatprep.mubr.f32.mxu1 %v4280_v1 }
 0x16a   :  { %3559 = vmatpush1.bf16.msra.mxu0 %v4743_v44  ;;  %3256 = vmatmul.mubr.msk.f32.gmra.mrb[36].mxu1 %vm954_vm1, %v4725_v27 }
 0x16b   :  { %3561 = vmatprep.subr.bf16.mxu0 %v4786_v23  ;;  %1304 = vmatprep.mubr.f32.mxu0 %v4280_v1 }
 0x16c   :  { %3539 = vmatpush1.bf16.msra.mxu1 %v4710_v15  ;;  %3259 = vmatmul.mubr.msk.f32.gmra.mrb[34].mxu0 %vm954_vm1, %v4715_v54 }
 0x16d   :  { %3541 = vmatprep.subr.bf16.mxu1 %v4756_v60  ;;  %1227 = vmatprep.mubr.f32.mxu1 %v4280_v1 }
 0x16e   :  { %3563 = vmatpush1.bf16.msra.mxu0 %v4789_v24  ;;  %3257 = vmatmul.mubr.msk.f32.gmra.mrb[38].mxu1 %vm954_vm1, %v4749_v48 }
 0x16f   :  { %3565 = vmatprep.subr.bf16.mxu0 %v4809_v36  ;;  %1310 = vmatprep.mubr.f32.mxu0 %v4280_v1 }
 0x170   :  { %3543 = vmatpush1.bf16.msra.mxu1 %v4743_v44  ;;  %3260 = vmatmul.mubr.msk.f32.gmra.mrb[36].mxu0 %vm954_vm1, %v4725_v27 }
 0x171   :  { %3545 = vmatprep.subr.bf16.mxu1 %v4786_v23  ;;  %1316 = vmatprep.mubr.f32.mxu0 %v4280_v1 }
 0x172   :  { %3567 = vmatpush1.bf16.msra.mxu0 %v4797_v33  ;;  %1387 = vmatprep.mubr.f32.mxu1 %v4280_v1 }
 0x173   :  { %3569 = vmatprep.subr.bf16.mxu0 %v4799_v30 }
 0x174   :  { %3547 = vmatpush1.bf16.msra.mxu1 %v4789_v24  ;;  %3261 = vmatmul.mubr.msk.f32.gmra.mrb[38].mxu0 %vm954_vm1, %v4749_v48 }
 0x175   :  { %3549 = vmatprep.subr.bf16.mxu1 %v4809_v36  ;;  %1476 = vmatprep.mubr.f32.mxu0 %v4280_v1 }
 0x176   :  { %3571 = vmatpush1.bf16.msra.mxu0 %v4773_v20 }
 0x177   :  { %3573 = vmatprep.subr.bf16.mxu0 %v4830_v14 }
 0x178   :  { %3551 = vmatpush1.bf16.msra.mxu1 %v4797_v33 }
 0x179   :  { %3553 = vmatprep.subr.bf16.mxu1 %v4799_v30 }
 0x17a   :  { %3575 = vmatpush1.bf16.msra.mxu0 %v4812_v37 }
 0x17b   :  { %3577 = vmatprep.subr.bf16.mxu0 %v4879_v9 }
 0x17c   :  { %3555 = vmatpush1.bf16.msra.mxu1 %v4773_v20 }
 0x17d   :  { %1351 = vmatprep.subr.mxu1 %v4802_v31 }
 0x17e   :  { %3579 = vmatpush1.bf16.msra.mxu0 %v4820_v42 }
 0x17f   :  { %3581 = vmatprep.subr.bf16.mxu0 %v4858_v46 }
 0x180   :  { %1352 = vmatpush1.msra.mxu1 %v4792_v25 }
 0x181   :  { %3262 = vmatmul.mubr.msk.f32.vlgmr.msra.gmra.mrb[40].mxu1 %vm954_vm1, %v4693_v6  ;;  %3585 = vmatprep.subr.bf16.mxu1 %v4799_v30 }
 0x182   :  { %3583 = vmatpush1.bf16.msra.mxu0 %v4846_v58  ;;  %3587 = vmatpush1.bf16.msra.mxu1 %v4773_v20 }
 0x183   :  { %1440 = vmatprep.subr.mxu0 %v947_v51  ;;  %3589 = vmatprep.subr.bf16.mxu1 %v4830_v14 }
 0x184   :  { %1393 = vmatprep.mubr.f32.mxu1 %v4280_v1 }
 0x185   :  { %3263 = vmatmul.mubr.msk.f32.gmra.mrb[42].mxu1 %vm954_vm1, %v4715_v54 }
 0x186   :  { %1441 = vmatpush1.msra.mxu0 %v4861_v43  ;;  %3591 = vmatpush1.bf16.msra.mxu1 %v4812_v37  ;;  %v5083_v37 = vpop.permute.xlu1 %1764 }
 0x187   :  { %3266 = vmatmul.mubr.msk.f32.vlgmr.msra.gmra.mrb[40].mxu0 %vm954_vm1, %v4693_v6  ;;  %3593 = vmatprep.subr.bf16.mxu1 %v4879_v9 }
 0x188   :  { %3613 = vmatprep.subr.bf16.mxu0 %v4858_v46  ;;  %1399 = vmatprep.mubr.f32.mxu1 %v4280_v1 }
 0x189   :  { %3615 = vmatpush1.bf16.msra.mxu0 %v4846_v58  ;;  %3264 = vmatmul.mubr.msk.f32.gmra.mrb[44].mxu1 %vm954_vm1, %v4725_v27 }
 0x18a   :  { %3617 = vmatprep.subr.bf16.mxu0 %v4885_v52  ;;  %1482 = vmatprep.mubr.f32.mxu0 %v4280_v1 }
 0x18b   :  { %3595 = vmatpush1.bf16.msra.mxu1 %v4820_v42  ;;  %3267 = vmatmul.mubr.msk.f32.gmra.mrb[42].mxu0 %vm954_vm1, %v4715_v54 }
 0x18c   :  { %3597 = vmatprep.subr.bf16.mxu1 %v4858_v46  ;;  %1405 = vmatprep.mubr.f32.mxu1 %v4280_v1 }
 0x18d   :  { %3619 = vmatpush1.bf16.msra.mxu0 %v4882_v7  ;;  %3265 = vmatmul.mubr.msk.f32.gmra.mrb[46].mxu1 %vm954_vm1, %v4749_v48 }
 0x18e   :  { %3621 = vmatprep.subr.bf16.mxu0 %v4888_v10  ;;  %1488 = vmatprep.mubr.f32.mxu0 %v4280_v1 }
 0x18f   :  { %3599 = vmatpush1.bf16.msra.mxu1 %v4846_v58  ;;  %3268 = vmatmul.mubr.msk.f32.gmra.mrb[44].mxu0 %vm954_vm1, %v4725_v27 }
 0x190   :  { %3601 = vmatprep.subr.bf16.mxu1 %v4885_v52  ;;  %1494 = vmatprep.mubr.f32.mxu0 %v4280_v1 }
 0x191   :  { %3623 = vmatpush1.bf16.msra.mxu0 %v4890_v11  ;;  %1565 = vmatprep.mubr.f32.mxu1 %v4280_v1 }
 0x192   :  { %3625 = vmatprep.subr.bf16.mxu0 %v4867_v49 }
 0x193   :  { %3603 = vmatpush1.bf16.msra.mxu1 %v4882_v7  ;;  %3269 = vmatmul.mubr.msk.f32.gmra.mrb[46].mxu0 %vm954_vm1, %v4749_v48 }
 0x194   :  { %3605 = vmatprep.subr.bf16.mxu1 %v4888_v10  ;;  %1654 = vmatprep.mubr.f32.mxu0 %v4280_v1 }
 0x195   :  { %3627 = vmatpush1.bf16.msra.mxu0 %v4853_v40 }
 0x196   :  { %3629 = vmatprep.subr.bf16.mxu0 %v3628_v59 }
 0x197   :  { %3607 = vmatpush1.bf16.msra.mxu1 %v4890_v11 }
 0x198   :  { %3609 = vmatprep.subr.bf16.mxu1 %v4867_v49 }
 0x199   :  { %3631 = vmatpush1.bf16.msra.mxu0 %v3630_v32 }
 0x19a   :  { %3632 = vmatprep.subr.bf16.mxu0 %v4279_v0 }
 0x19b   :  { %3611 = vmatpush1.bf16.msra.mxu1 %v4853_v40 }
 0x19c   :  { %1529 = vmatprep.subr.mxu1 %v4875_v2  ;;  %v5129_v2 = vpop.permute.xlu1 %1852 }
 0x19d   :  { %3634 = vmatpush1.bf16.msra.mxu0 %v3633_v3 }
 0x19e   :  { %3635 = vmatprep.subr.bf16.mxu0 %v4279_v0 }
 0x19f   :  { %1530 = vmatpush1.msra.mxu1 %v4870_v50 }
 0x1a0   :  { %3270 = vmatmul.mubr.msk.f32.vlgmr.msra.gmra.mrb[48].mxu1 %vm954_vm1, %v4693_v6  ;;  %3274 = vmatmul.mubr.msk.f32.vlgmr.msra.gmra.mrb[48].mxu0 %vm954_vm1, %v4693_v6  ;;  %v5055_v6 = vpop.permute.xlu0 %1749 }
 0x1a1   :  { %1571 = vmatprep.mubr.f32.mxu1 %v4280_v1  ;;  %1660 = vmatprep.mubr.f32.mxu0 %v4280_v1 }
 0x1a2   :  { %3636 = vmatpush1.bf16.msra.mxu0 %v4279_v0  ;;  %3693 = vmatprep.subr.bf16.mxu1 %v4279_v0 }
 0x1a3   :  { %3637 = vmatprep.subr.bf16.mxu0 %v4279_v0  ;;  %3694 = vmatpush1.bf16.msra.mxu1 %v4279_v0 }
 0x1a4   :  { %3271 = vmatmul.mubr.msk.f32.gmra.mrb[50].mxu1 %vm954_vm1, %v4715_v54  ;;  %3275 = vmatmul.mubr.msk.f32.gmra.mrb[50].mxu0 %vm954_vm1, %v4715_v54  ;;  %v5065_v44 = vpop.permute.xlu0 %1837 }
 0x1a5   :  { %1577 = vmatprep.mubr.f32.mxu1 %v4280_v1  ;;  %1666 = vmatprep.mubr.f32.mxu0 %v4280_v1 }
 0x1a6   :  { %3638 = vmatpush1.bf16.msra.mxu0 %v4279_v0  ;;  %3695 = vmatprep.subr.bf16.mxu1 %v4279_v0 }
 0x1a7   :  { %3639 = vmatprep.subr.bf16.mxu0 %v4279_v0  ;;  %3696 = vmatpush1.bf16.msra.mxu1 %v4279_v0 }
 0x1a8   :  { %3272 = vmatmul.mubr.msk.f32.gmra.mrb[52].mxu1 %vm954_vm1, %v4725_v27  ;;  %3276 = vmatmul.mubr.msk.f32.gmra.mrb[52].mxu0 %vm954_vm1, %v4725_v27  ;;  %v5090_v16 = vpop.permute.xlu0 %1759 }
 0x1a9   :  { %1583 = vmatprep.mubr.f32.mxu1 %v4280_v1  ;;  %1672 = vmatprep.mubr.f32.mxu0 %v4280_v1 }
 0x1aa   :  { %3640 = vmatpush1.bf16.msra.mxu0 %v4279_v0 }
 0x1ab   :  { %3641 = vmatprep.subr.bf16.mxu0 %v4279_v0 }
 0x1ac   :  { %3273 = vmatmul.mubr.msk.f32.gmra.mrb[54].mxu1 %vm954_vm1, %v4749_v48  ;;  %3277 = vmatmul.mubr.msk.f32.gmra.mrb[54].mxu0 %vm954_vm1, %v4749_v48  ;;  %v5131_v9 = vpop.permute.xlu0 %1847 }
 0x1ad   :  { %1990 = vmatprep.mubr.f32.mxu0 %v5049_v4  ;;  %2132 = vmatprep.mubr.f32.mxu1 %v5049_v4 }
 0x1ae   :  { %3642 = vmatpush1.bf16.msra.mxu0 %v4279_v0 }
 0x1af   :  { %3643 = vmatprep.subr.bf16.mxu0 %v4279_v0 }
 0x1b2   :  { %3644 = vmatpush1.bf16.msra.mxu0 %v4279_v0 }
 0x1b3   :  { %3645 = vmatprep.subr.bf16.mxu0 %v4279_v0 }
 0x1b6   :  { %3646 = vmatpush1.bf16.msra.mxu0 %v4279_v0 }
 0x216   :  { %v1033_v13 = vpop.f32.mrb[24].mxu1 }
 0x217   :  { %v1679_v15 = vmax.f32 %v1033_v13, 0.0  ;;  %3138 = vst [vmem:[%s5818_s11] sm:$0xff] %v1033_v13  ;;  %v1035_v54 = vpop.f32.mrb[25].mxu1 }
 0x218   :  { %v1680_v27 = vmax.f32 %v1035_v54, 0.0  ;;  %3139 = vst [vmem:[%s5818_s11 + $0x8] sm:$0xff] %v1035_v54 }
 0x219   :  { %v1767_v60 = vmul.f32 %v5055_v6, %v1679_v15 }
 0x21a   :  { %v1039_v48 = vpop.f32.mrb[26].mxu1  ;;  %v1768_v20 = vmul.f32 %v5055_v6, %v1680_v27 }
 0x21b   :  { %v1695_v8 = vmax.f32 %v1039_v48, 0.0  ;;  %3154 = vst [vmem:[%s5818_s11 + $0x80] sm:$0xff] %v1039_v48  ;;  %v1041_v19 = vpop.f32.mrb[27].mxu1  ;;  %v1855_v42 = vadd.f32 %v5065_v44, %v1767_v60 }
 0x21c   :  { %v1696_v38 = vmax.f32 %v1041_v19, 0.0  ;;  %3155 = vst [vmem:[%s5818_s11 + $0x88] sm:$0xff] %v1041_v19  ;;  %v1122_v23 = vpop.f32.mrb[24].mxu0  ;;  %v1856_v17 = vadd.f32 %v5065_v44, %v1768_v20 }
 0x21d   :  { %v1783_v24 = vmul.f32 %v5053_v5, %v1695_v8  ;;  %v1681_v25 = vmax.f32 %v1122_v23, 0.0  ;;  %3140 = vst [vmem:[%s5818_s11 + $0x10] sm:$0xff] %v1122_v23  ;;  %v1124_v33 = vpop.f32.mrb[25].mxu0 }
 0x21e   :  { %v1784_v30 = vmul.f32 %v5053_v5, %v1696_v38  ;;  %v1682_v31 = vmax.f32 %v1124_v33, 0.0  ;;  %3141 = vst [vmem:[%s5818_s11 + $0x18] sm:$0xff] %v1124_v33  ;;  %v1045_v36 = vpop.f32.mrb[28].mxu1 }
 0x21f   :  { %v1871_v14 = vadd.f32 %v5063_v18, %v1783_v24  ;;  %v1711_v55 = vmax.f32 %v1045_v36, 0.0  ;;  %3170 = vst [vmem:[%s5818_s11 + $0x100] sm:$0xff] %v1045_v36  ;;  %v1047_v57 = vpop.f32.mrb[29].mxu1  ;;  %v1769_v47 = vmul.f32 %v5055_v6, %v1681_v25 }
 0x220   :  { %v1872_v53 = vadd.f32 %v5063_v18, %v1784_v30  ;;  %v1712_v21 = vmax.f32 %v1047_v57, 0.0  ;;  %3171 = vst [vmem:[%s5818_s11 + $0x108] sm:$0xff] %v1047_v57  ;;  %v1128_v22 = vpop.f32.mrb[26].mxu0  ;;  %v1770_v35 = vmul.f32 %v5055_v6, %v1682_v31 }
 0x221   :  { %v5097_v26 = vpack.c.bf16 %v1871_v14, %v1855_v42  ;;  %v1697_v29 = vmax.f32 %v1128_v22, 0.0  ;;  %3156 = vst [vmem:[%s5818_s11 + $0x90] sm:$0xff] %v1128_v22  ;;  %v1130_v28 = vpop.f32.mrb[27].mxu0  ;;  %v1799_v58 = vmul.f32 %v5090_v16, %v1711_v55  ;;  %v1857_v43 = vadd.f32 %v5065_v44, %v1769_v47 }
 0x222   :  { %v5103_v34 = vpack.c.bf16 %v1872_v53, %v1856_v17  ;;  %v1698_v63 = vmax.f32 %v1130_v28, 0.0  ;;  %3157 = vst [vmem:[%s5818_s11 + $0x98] sm:$0xff] %v1130_v28  ;;  %v1051_v61 = vpop.f32.mrb[30].mxu1  ;;  %v1800_v40 = vmul.f32 %v5090_v16, %v1712_v21  ;;  %v1858_v7 = vadd.f32 %v5065_v44, %v1770_v35 }
 0x223   :  { %v1785_v62 = vmul.f32 %v5053_v5, %v1697_v29  ;;  %v1727_v56 = vmax.f32 %v1051_v61, 0.0  ;;  %3186 = vst [vmem:[%s5818_s11 + $0x180] sm:$0x3f] %v1051_v61  ;;  %v1053_v39 = vpop.f32.mrb[31].mxu1  ;;  %3648 = vmatprep.subr.bf16.mxu0 %v5097_v26  ;;  %3698 = vmatprep.subr.bf16.mxu1 %v5097_v26  ;;  %v1887_v32 = vadd.f32 %v5131_v9, %v1799_v58 }
 0x224   :  { %v1786_v41 = vmul.f32 %v5053_v5, %v1698_v63  ;;  %v1728_v45 = vmax.f32 %v1053_v39, 0.0  ;;  %3187 = vst [vmem:[%s5818_s11 + $0x188] sm:$0x3f] %v1053_v39  ;;  %v1134_v46 = vpop.f32.mrb[28].mxu0  ;;  %3649 = vmatpush1.bf16.msra.mxu0 %v4279_v0  ;;  %3699 = vmatpush1.bf16.msra.mxu1 %v4279_v0  ;;  %v1888_v13 = vadd.f32 %v5131_v9, %v1800_v40 }
 0x225   :  { %v1873_v12 = vadd.f32 %v5063_v18, %v1785_v62  ;;  %v1815_v49 = vmul.f32 %v5083_v37, %v1727_v56  ;;  %v1713_v50 = vmax.f32 %v1134_v46, 0.0  ;;  %3172 = vst [vmem:[%s5818_s11 + $0x110] sm:$0xff] %v1134_v46  ;;  %v1136_v51 = vpop.f32.mrb[29].mxu0 }
 0x226   :  { %v1874_v52 = vadd.f32 %v5063_v18, %v1786_v41  ;;  %v1816_v10 = vmul.f32 %v5083_v37, %v1728_v45  ;;  %v1714_v11 = vmax.f32 %v1136_v51, 0.0  ;;  %3173 = vst [vmem:[%s5818_s11 + $0x118] sm:$0xff] %v1136_v51 }
 0x227   :  { %v5140_v3 = vpack.c.bf16 %v1873_v12, %v1857_v43  ;;  %v1903_v59 = vadd.f32 %v5129_v2, %v1815_v49  ;;  %v1801_v60 = vmul.f32 %v5090_v16, %v1713_v50 }
 0x228   :  { %v5144_v15 = vpack.c.bf16 %v1874_v52, %v1858_v7  ;;  %v1904_v54 = vadd.f32 %v5129_v2, %v1816_v10  ;;  %v1140_v27 = vpop.f32.mrb[30].mxu0  ;;  %v1802_v38 = vmul.f32 %v5090_v16, %v1714_v11 }
 0x229   :  { %v5147_v48 = vpack.c.bf16 %v1903_v59, %v1887_v32  ;;  %v1729_v8 = vmax.f32 %v1140_v27, 0.0  ;;  %3188 = vst [vmem:[%s5818_s11 + $0x190] sm:$0x3f] %v1140_v27  ;;  %v1142_v19 = vpop.f32.mrb[31].mxu0  ;;  %v1889_v33 = vadd.f32 %v5131_v9, %v1801_v60 }
 0x22a   :  { %v5153_v20 = vpack.c.bf16 %v1904_v54, %v1888_v13  ;;  %v1730_v23 = vmax.f32 %v1142_v19, 0.0  ;;  %3189 = vst [vmem:[%s5818_s11 + $0x198] sm:$0x3f] %v1142_v19  ;;  %v1890_v31 = vadd.f32 %v5131_v9, %v1802_v38 }
 0x22b   :  { %v1817_v24 = vmul.f32 %v5083_v37, %v1729_v8  ;;  %3651 = vmatprep.subr.bf16.mxu0 %v5147_v48  ;;  %3701 = vmatprep.subr.bf16.mxu1 %v5147_v48 }
 0x22c   :  { %v1818_v25 = vmul.f32 %v5083_v37, %v1730_v23  ;;  %3652 = vmatpush1.bf16.msra.mxu0 %v4279_v0  ;;  %3702 = vmatpush1.bf16.msra.mxu1 %v4279_v0 }
 0x22d   :  { %v1905_v30 = vadd.f32 %v5129_v2, %v1817_v24  ;;  %3654 = vmatprep.subr.bf16.mxu0 %v5103_v34  ;;  %3704 = vmatprep.subr.bf16.mxu1 %v5103_v34 }
 0x22e   :  { %v1906_v36 = vadd.f32 %v5129_v2, %v1818_v25 }
 0x22f   :  { %v5171_v42 = vpack.c.bf16 %v1905_v30, %v1889_v33 }
 0x230   :  { %v5173_v14 = vpack.c.bf16 %v1906_v36, %v1890_v31  ;;  %3656 = vmatpush1.bf16.msra.mxu0 %v5097_v26  ;;  %3706 = vmatpush1.bf16.msra.mxu1 %v5097_v26 }
 0x231   :  { %3658 = vmatprep.subr.bf16.mxu0 %v5153_v20  ;;  %3708 = vmatprep.subr.bf16.mxu1 %v5153_v20 }
 0x234   :  { %3660 = vmatpush1.bf16.msra.mxu0 %v5147_v48  ;;  %3710 = vmatpush1.bf16.msra.mxu1 %v5147_v48 }
 0x235   :  { %v1211_v55 = vpop.f32.mrb[32].mxu1  ;;  %3662 = vmatprep.subr.bf16.mxu0 %v5140_v3  ;;  %3712 = vmatprep.subr.bf16.mxu1 %v5140_v3 }
 0x236   :  { %v1683_v57 = vmax.f32 %v1211_v55, 0.0  ;;  %3142 = vst [vmem:[%s5818_s11 + $0x20] sm:$0xff] %v1211_v55  ;;  %v1213_v17 = vpop.f32.mrb[33].mxu1 }
 0x237   :  { %v1684_v53 = vmax.f32 %v1213_v17, 0.0  ;;  %3143 = vst [vmem:[%s5818_s11 + $0x28] sm:$0xff] %v1213_v17 }
 0x238   :  { %3664 = vmatpush1.bf16.msra.mxu0 %v5103_v34  ;;  %3714 = vmatpush1.bf16.msra.mxu1 %v5103_v34  ;;  %v1771_v22 = vmul.f32 %v5055_v6, %v1683_v57 }
 0x239   :  { %v1217_v21 = vpop.f32.mrb[34].mxu1  ;;  %3666 = vmatprep.subr.bf16.mxu0 %v5171_v42  ;;  %3716 = vmatprep.subr.bf16.mxu1 %v5171_v42  ;;  %v1772_v28 = vmul.f32 %v5055_v6, %v1684_v53 }
 0x23a   :  { %v1699_v47 = vmax.f32 %v1217_v21, 0.0  ;;  %3158 = vst [vmem:[%s5818_s11 + $0xa0] sm:$0xff] %v1217_v21  ;;  %v1219_v29 = vpop.f32.mrb[35].mxu1  ;;  %v1859_v41 = vadd.f32 %v5065_v44, %v1771_v22 }
 0x23b   :  { %v1700_v35 = vmax.f32 %v1219_v29, 0.0  ;;  %3159 = vst [vmem:[%s5818_s11 + $0xa8] sm:$0xff] %v1219_v29  ;;  %v1300_v63 = vpop.f32.mrb[32].mxu0  ;;  %v1860_v12 = vadd.f32 %v5065_v44, %v1772_v28 }
 0x23c   :  { %v1787_v61 = vmul.f32 %v5053_v5, %v1699_v47  ;;  %v1685_v58 = vmax.f32 %v1300_v63, 0.0  ;;  %3144 = vst [vmem:[%s5818_s11 + $0x30] sm:$0xff] %v1300_v63  ;;  %v1302_v62 = vpop.f32.mrb[33].mxu0  ;;  %3668 = vmatpush1.bf16.msra.mxu0 %v5153_v20  ;;  %3718 = vmatpush1.bf16.msra.mxu1 %v5153_v20 }
 0x23d   :  { %v1788_v56 = vmul.f32 %v5053_v5, %v1700_v35  ;;  %v1686_v39 = vmax.f32 %v1302_v62, 0.0  ;;  %3145 = vst [vmem:[%s5818_s11 + $0x38] sm:$0xff] %v1302_v62  ;;  %v1223_v40 = vpop.f32.mrb[36].mxu1  ;;  %3670 = vmatprep.subr.bf16.mxu0 %v5144_v15  ;;  %3720 = vmatprep.subr.bf16.mxu1 %v5144_v15 }
 0x23e   :  { %v1875_v45 = vadd.f32 %v5063_v18, %v1787_v61  ;;  %v1715_v46 = vmax.f32 %v1223_v40, 0.0  ;;  %3174 = vst [vmem:[%s5818_s11 + $0x120] sm:$0xff] %v1223_v40  ;;  %v1225_v43 = vpop.f32.mrb[37].mxu1  ;;  %v1773_v52 = vmul.f32 %v5055_v6, %v1685_v58 }
 0x23f   :  { %v1876_v49 = vadd.f32 %v5063_v18, %v1788_v56  ;;  %v1716_v50 = vmax.f32 %v1225_v43, 0.0  ;;  %3175 = vst [vmem:[%s5818_s11 + $0x128] sm:$0xff] %v1225_v43  ;;  %v1306_v51 = vpop.f32.mrb[34].mxu0  ;;  %v1774_v59 = vmul.f32 %v5055_v6, %v1686_v39 }
 0x240   :  { %v5223_v7 = vpack.c.bf16 %v1875_v45, %v1859_v41  ;;  %v1701_v10 = vmax.f32 %v1306_v51, 0.0  ;;  %3160 = vst [vmem:[%s5818_s11 + $0xb0] sm:$0xff] %v1306_v51  ;;  %v1308_v11 = vpop.f32.mrb[35].mxu0  ;;  %3672 = vmatpush1.bf16.msra.mxu0 %v5140_v3  ;;  %3722 = vmatpush1.bf16.msra.mxu1 %v5140_v3  ;;  %v1803_v27 = vmul.f32 %v5090_v16, %v1715_v46 }
 0x241   :  { %v5231_v32 = vpack.c.bf16 %v1876_v49, %v1860_v12  ;;  %v1702_v13 = vmax.f32 %v1308_v11, 0.0  ;;  %3161 = vst [vmem:[%s5818_s11 + $0xb8] sm:$0xff] %v1308_v11  ;;  %v1229_v54 = vpop.f32.mrb[38].mxu1  ;;  %3674 = vmatprep.subr.bf16.mxu0 %v5173_v14  ;;  %3724 = vmatprep.subr.bf16.mxu1 %v5173_v14  ;;  %v1804_v38 = vmul.f32 %v5090_v16, %v1716_v50  ;;  %v5295_v50 = vld [vmem:[#allocation7] sm:$0xff] }
 0x242   :  { %v1789_v60 = vmul.f32 %v5053_v5, %v1701_v10  ;;  %v1731_v8 = vmax.f32 %v1229_v54, 0.0  ;;  %3190 = vst [vmem:[%s5818_s11 + $0x1a0] sm:$0x3f] %v1229_v54  ;;  %v1231_v19 = vpop.f32.mrb[39].mxu1  ;;  %v1861_v33 = vadd.f32 %v5065_v44, %v1773_v52  ;;  %v1862_v57 = vadd.f32 %v5065_v44, %v1774_v59 }
 0x243   :  { %v1790_v23 = vmul.f32 %v5053_v5, %v1702_v13  ;;  %v1732_v24 = vmax.f32 %v1231_v19, 0.0  ;;  %3191 = vst [vmem:[%s5818_s11 + $0x1a8] sm:$0x3f] %v1231_v19  ;;  %v1312_v25 = vpop.f32.mrb[36].mxu0  ;;  %v1891_v22 = vadd.f32 %v5131_v9, %v1803_v27  ;;  %v1892_v28 = vadd.f32 %v5131_v9, %v1804_v38  ;;  %v5313_v13 = vld [vmem:[#allocation7 + $0x10] sm:$0xff] }
 0x244   :  { %v1877_v30 = vadd.f32 %v5063_v18, %v1789_v60  ;;  %v1819_v31 = vmul.f32 %v5083_v37, %v1731_v8  ;;  %v1717_v36 = vmax.f32 %v1312_v25, 0.0  ;;  %3176 = vst [vmem:[%s5818_s11 + $0x130] sm:$0xff] %v1312_v25  ;;  %v1314_v55 = vpop.f32.mrb[37].mxu0  ;;  %3676 = vmatpush1.bf16.msra.mxu0 %v5171_v42  ;;  %3726 = vmatpush1.bf16.msra.mxu1 %v5171_v42 }
 0x245   :  { %v1878_v17 = vadd.f32 %v5063_v18, %v1790_v23  ;;  %v1820_v53 = vmul.f32 %v5083_v37, %v1732_v24  ;;  %v1718_v21 = vmax.f32 %v1314_v55, 0.0  ;;  %3177 = vst [vmem:[%s5818_s11 + $0x138] sm:$0xff] %v1314_v55  ;;  %3678 = vmatprep.subr.bf16.mxu0 %v5223_v7  ;;  %3728 = vmatprep.subr.bf16.mxu1 %v5223_v7 }
 0x246   :  { %v5266_v47 = vpack.c.bf16 %v1877_v30, %v1861_v33  ;;  %v1907_v29 = vadd.f32 %v5129_v2, %v1819_v31  ;;  %v1805_v62 = vmul.f32 %v5090_v16, %v1717_v36 }
 0x247   :  { %v5270_v35 = vpack.c.bf16 %v1878_v17, %v1862_v57  ;;  %v1908_v63 = vadd.f32 %v5129_v2, %v1820_v53  ;;  %v1318_v61 = vpop.f32.mrb[38].mxu0  ;;  %v1806_v41 = vmul.f32 %v5090_v16, %v1718_v21 }
 0x248   :  { %v5273_v58 = vpack.c.bf16 %v1907_v29, %v1891_v22  ;;  %v1733_v56 = vmax.f32 %v1318_v61, 0.0  ;;  %3192 = vst [vmem:[%s5818_s11 + $0x1b0] sm:$0x3f] %v1318_v61  ;;  %v1320_v39 = vpop.f32.mrb[39].mxu0  ;;  %3680 = vmatpush1.bf16.msra.mxu0 %v5144_v15  ;;  %3730 = vmatpush1.bf16.msra.mxu1 %v5144_v15  ;;  %v1893_v12 = vadd.f32 %v5131_v9, %v1805_v62 }
 0x249   :  { %v5281_v40 = vpack.c.bf16 %v1908_v63, %v1892_v28  ;;  %v1734_v45 = vmax.f32 %v1320_v39, 0.0  ;;  %3193 = vst [vmem:[%s5818_s11 + $0x1b8] sm:$0x3f] %v1320_v39  ;;  %v1894_v51 = vadd.f32 %v5131_v9, %v1806_v41 }
 0x24a   :  { %v1821_v46 = vmul.f32 %v5083_v37, %v1733_v56  ;;  %3682 = vmatprep.subr.bf16.mxu0 %v5273_v58  ;;  %3732 = vmatprep.subr.bf16.mxu1 %v5273_v58 }
 0x24b   :  { %v1822_v43 = vmul.f32 %v5083_v37, %v1734_v45 }
 0x24c   :  { %v1909_v49 = vadd.f32 %v5129_v2, %v1821_v46  ;;  %3684 = vmatpush1.bf16.msra.mxu0 %v5173_v14  ;;  %3734 = vmatpush1.bf16.msra.mxu1 %v5173_v14 }
 0x24d   :  { %v1910_v52 = vadd.f32 %v5129_v2, %v1822_v43  ;;  %3686 = vmatprep.subr.bf16.mxu0 %v5231_v32  ;;  %3736 = vmatprep.subr.bf16.mxu1 %v5231_v32 }
 0x24e   :  { %v5301_v10 = vpack.c.bf16 %v1909_v49, %v1893_v12 }
 0x24f   :  { %v5303_v11 = vpack.c.bf16 %v1910_v52, %v1894_v51  ;;  %1991 = vmatmul.mubr.f32.vlgmr.msra.gmra.mrb[56].mxu0 %v5295_v50 }
 0x250   :  { %3688 = vmatpush1.bf16.msra.mxu0 %v5223_v7  ;;  %3738 = vmatpush1.bf16.msra.mxu1 %v5223_v7 }
 0x251   :  { %3690 = vmatprep.subr.bf16.mxu0 %v5281_v40  ;;  %3740 = vmatprep.subr.bf16.mxu1 %v5281_v40 }
 0x252   :  { %2061 = vmatprep.mubr.f32.mxu0 %v4280_v1 }
 0x254   :  { %v1389_v59 = vpop.f32.mrb[40].mxu1  ;;  %3692 = vmatpush1.bf16.msra.mxu0 %v5273_v58  ;;  %3742 = vmatpush1.bf16.msra.mxu1 %v5273_v58 }
 0x255   :  { %v1687_v54 = vmax.f32 %v1389_v59, 0.0  ;;  %3146 = vst [vmem:[%s5818_s11 + $0x40] sm:$0xff] %v1389_v59  ;;  %v1391_v27 = vpop.f32.mrb[41].mxu1  ;;  %3744 = vmatprep.subr.bf16.mxu1 %v5266_v47  ;;  %3760 = vmatprep.subr.bf16.mxu0 %v5103_v34 }
 0x256   :  { %v1688_v60 = vmax.f32 %v1391_v27, 0.0  ;;  %3147 = vst [vmem:[%s5818_s11 + $0x48] sm:$0xff] %v1391_v27 }
 0x257   :  { %3278 = vmatmul.mubr.msk.f32.vlgmr.msra.gmra.mrb[56].mxu0 %vm1922_vm2, %v5313_v13  ;;  %v1775_v19 = vmul.f32 %v5055_v6, %v1687_v54 }
 0x258   :  { %v1395_v8 = vpop.f32.mrb[42].mxu1  ;;  %3746 = vmatpush1.bf16.msra.mxu1 %v5231_v32  ;;  %3762 = vmatpush1.bf16.msra.mxu0 %v5097_v26  ;;  %v1776_v24 = vmul.f32 %v5055_v6, %v1688_v60 }
 0x259   :  { %v1703_v38 = vmax.f32 %v1395_v8, 0.0  ;;  %3162 = vst [vmem:[%s5818_s11 + $0xc0] sm:$0xff] %v1395_v8  ;;  %v1397_v23 = vpop.f32.mrb[43].mxu1  ;;  %3748 = vmatprep.subr.bf16.mxu1 %v5301_v10  ;;  %3764 = vmatprep.subr.bf16.mxu0 %v5153_v20  ;;  %v1863_v17 = vadd.f32 %v5065_v44, %v1775_v19 }
 0x25a   :  { %v1704_v25 = vmax.f32 %v1397_v23, 0.0  ;;  %3163 = vst [vmem:[%s5818_s11 + $0xc8] sm:$0xff] %v1397_v23  ;;  %v1478_v26 = vpop.f32.mrb[40].mxu0  ;;  %2274 = vmatprep.mubr.f32.mxu0 %v5049_v4  ;;  %v1864_v29 = vadd.f32 %v5065_v44, %v1776_v24 }
 0x25b   :  { %v1791_v33 = vmul.f32 %v5053_v5, %v1703_v38  ;;  %v1689_v30 = vmax.f32 %v1478_v26, 0.0  ;;  %3148 = vst [vmem:[%s5818_s11 + $0x50] sm:$0xff] %v1478_v26  ;;  %v1480_v31 = vpop.f32.mrb[41].mxu0 }
 0x25c   :  { %v1792_v36 = vmul.f32 %v5053_v5, %v1704_v25  ;;  %v1690_v55 = vmax.f32 %v1480_v31, 0.0  ;;  %3149 = vst [vmem:[%s5818_s11 + $0x58] sm:$0xff] %v1480_v31  ;;  %v1401_v57 = vpop.f32.mrb[44].mxu1  ;;  %3750 = vmatpush1.bf16.msra.mxu1 %v5281_v40  ;;  %3766 = vmatpush1.bf16.msra.mxu0 %v5147_v48 }
 0x25d   :  { %v1879_v53 = vadd.f32 %v5063_v18, %v1791_v33  ;;  %v1719_v21 = vmax.f32 %v1401_v57, 0.0  ;;  %3178 = vst [vmem:[%s5818_s11 + $0x140] sm:$0xff] %v1401_v57  ;;  %v1403_v22 = vpop.f32.mrb[45].mxu1  ;;  %3752 = vmatprep.subr.bf16.mxu1 %v5270_v35  ;;  %3768 = vmatprep.subr.bf16.mxu0 %v5140_v3  ;;  %v1777_v62 = vmul.f32 %v5055_v6, %v1689_v30 }
 0x25e   :  { %v1880_v28 = vadd.f32 %v5063_v18, %v1792_v36  ;;  %v1720_v63 = vmax.f32 %v1403_v22, 0.0  ;;  %3179 = vst [vmem:[%s5818_s11 + $0x148] sm:$0xff] %v1403_v22  ;;  %v1484_v48 = vpop.f32.mrb[42].mxu0  ;;  %v1778_v45 = vmul.f32 %v5055_v6, %v1690_v55 }
 0x25f   :  { %v5360_v61 = vpack.c.bf16 %v1879_v53, %v1863_v17  ;;  %v1705_v56 = vmax.f32 %v1484_v48, 0.0  ;;  %3164 = vst [vmem:[%s5818_s11 + $0xd0] sm:$0xff] %v1484_v48  ;;  %v1486_v39 = vpop.f32.mrb[43].mxu0  ;;  %2133 = vmatmul.mubr.f32.vlgmr.msra.gmra.mrb[56].mxu1 %v5295_v50  ;;  %v1807_v12 = vmul.f32 %v5090_v16, %v1719_v21  ;;  %v1865_v60 = vadd.f32 %v5065_v44, %v1777_v62 }
 0x260   :  { %v5367_v41 = vpack.c.bf16 %v1880_v28, %v1864_v29  ;;  %v1706_v46 = vmax.f32 %v1486_v39, 0.0  ;;  %3165 = vst [vmem:[%s5818_s11 + $0xd8] sm:$0xff] %v1486_v39  ;;  %v1407_v43 = vpop.f32.mrb[46].mxu1  ;;  %3754 = vmatpush1.bf16.msra.mxu1 %v5266_v47  ;;  %3770 = vmatpush1.bf16.msra.mxu0 %v5103_v34  ;;  %v1808_v59 = vmul.f32 %v5090_v16, %v1720_v63 }
 0x261   :  { %v1793_v49 = vmul.f32 %v5053_v5, %v1705_v56  ;;  %v1735_v51 = vmax.f32 %v1407_v43, 0.0  ;;  %3194 = vst [vmem:[%s5818_s11 + $0x1c0] sm:$0x3f] %v1407_v43  ;;  %v1409_v52 = vpop.f32.mrb[47].mxu1  ;;  %3756 = vmatprep.subr.bf16.mxu1 %v5303_v11  ;;  %3772 = vmatprep.subr.bf16.mxu0 %v5171_v42  ;;  %v1866_v24 = vadd.f32 %v5065_v44, %v1778_v45 }
 0x262   :  { %v1794_v54 = vmul.f32 %v5053_v5, %v1706_v46  ;;  %v1736_v27 = vmax.f32 %v1409_v52, 0.0  ;;  %3195 = vst [vmem:[%s5818_s11 + $0x1c8] sm:$0x3f] %v1409_v52  ;;  %v1490_v34 = vpop.f32.mrb[44].mxu0  ;;  %2203 = vmatprep.mubr.f32.mxu1 %v4280_v1  ;;  %v1895_v30 = vadd.f32 %v5131_v9, %v1807_v12  ;;  %v1896_v55 = vadd.f32 %v5131_v9, %v1808_v59 }
 0x263   :  { %v1881_v8 = vadd.f32 %v5063_v18, %v1793_v49  ;;  %v1823_v19 = vmul.f32 %v5083_v37, %v1735_v51  ;;  %v1721_v38 = vmax.f32 %v1490_v34, 0.0  ;;  %3180 = vst [vmem:[%s5818_s11 + $0x150] sm:$0xff] %v1490_v34  ;;  %v1492_v23 = vpop.f32.mrb[45].mxu0 }
 0x264   :  { %v1882_v25 = vadd.f32 %v5063_v18, %v1794_v54  ;;  %v1824_v26 = vmul.f32 %v5083_v37, %v1736_v27  ;;  %v1722_v33 = vmax.f32 %v1492_v23, 0.0  ;;  %3181 = vst [vmem:[%s5818_s11 + $0x158] sm:$0xff] %v1492_v23  ;;  %3758 = vmatpush1.bf16.msra.mxu1 %v5301_v10  ;;  %3774 = vmatpush1.bf16.msra.mxu0 %v5153_v20 }
 0x265   :  { %v5403_v31 = vpack.c.bf16 %v1881_v8, %v1865_v60  ;;  %v1911_v36 = vadd.f32 %v5129_v2, %v1823_v19  ;;  %3776 = vmatprep.subr.bf16.mxu0 %v5144_v15  ;;  %3832 = vmatprep.subr.bf16.mxu1 %v5144_v15  ;;  %v1809_v20 = vmul.f32 %v5090_v16, %v1721_v38 }
 0x266   :  { %v5409_v57 = vpack.c.bf16 %v1882_v25, %v1866_v24  ;;  %v1912_v17 = vadd.f32 %v5129_v2, %v1824_v26  ;;  %v1496_v53 = vpop.f32.mrb[46].mxu0  ;;  %v1810_v63 = vmul.f32 %v5090_v16, %v1722_v33 }
 0x267   :  { %v5412_v21 = vpack.c.bf16 %v1911_v36, %v1895_v30  ;;  %v1737_v22 = vmax.f32 %v1496_v53, 0.0  ;;  %3196 = vst [vmem:[%s5818_s11 + $0x1d0] sm:$0x3f] %v1496_v53  ;;  %v1498_v29 = vpop.f32.mrb[47].mxu0  ;;  %3279 = vmatmul.mubr.msk.f32.vlgmr.msra.gmra.mrb[56].mxu1 %vm1922_vm2, %v5313_v13  ;;  %v1897_v39 = vadd.f32 %v5131_v9, %v1809_v20 }
 0x268   :  { %v5420_v28 = vpack.c.bf16 %v1912_v17, %v1896_v55  ;;  %v1738_v48 = vmax.f32 %v1498_v29, 0.0  ;;  %3197 = vst [vmem:[%s5818_s11 + $0x1d8] sm:$0x3f] %v1498_v29  ;;  %3778 = vmatpush1.bf16.msra.mxu0 %v5140_v3  ;;  %3834 = vmatpush1.bf16.msra.mxu1 %v5140_v3  ;;  %v1898_v46 = vadd.f32 %v5131_v9, %v1810_v63 }
 0x269   :  { %v1825_v62 = vmul.f32 %v5083_v37, %v1737_v22  ;;  %3780 = vmatprep.subr.bf16.mxu0 %v5173_v14  ;;  %3836 = vmatprep.subr.bf16.mxu1 %v5173_v14 }
 0x26a   :  { %v1826_v56 = vmul.f32 %v5083_v37, %v1738_v48  ;;  %2416 = vmatprep.mubr.f32.mxu1 %v5049_v4 }
 0x26b   :  { %v1913_v45 = vadd.f32 %v5129_v2, %v1825_v62 }
 0x26c   :  { %v1914_v43 = vadd.f32 %v5129_v2, %v1826_v56  ;;  %3782 = vmatpush1.bf16.msra.mxu0 %v5171_v42  ;;  %3838 = vmatpush1.bf16.msra.mxu1 %v5171_v42 }
 0x26d   :  { %v5439_v3 = vpack.c.bf16 %v1913_v45, %v1897_v39  ;;  %3784 = vmatprep.subr.bf16.mxu0 %v5223_v7  ;;  %3840 = vmatprep.subr.bf16.mxu1 %v5223_v7 }
 0x26e   :  { %v5443_v12 = vpack.c.bf16 %v1914_v43, %v1898_v46 }
 0x270   :  { %3786 = vmatpush1.bf16.msra.mxu0 %v5144_v15  ;;  %3842 = vmatpush1.bf16.msra.mxu1 %v5144_v15 }
 0x271   :  { %3788 = vmatprep.subr.bf16.mxu0 %v5273_v58  ;;  %3844 = vmatprep.subr.bf16.mxu1 %v5273_v58 }
 0x273   :  { %v1567_v49 = vpop.f32.mrb[48].mxu1  ;;  %v1656_v51 = vpop.f32.mrb[48].mxu0 }
 0x274   :  { %v1691_v52 = vmax.f32 %v1567_v49, 0.0  ;;  %3150 = vst [vmem:[%s5818_s11 + $0x60] sm:$0xff] %v1567_v49  ;;  %v1693_v42 = vmax.f32 %v1656_v51, 0.0  ;;  %3152 = vst [vmem:[%s5818_s11 + $0x70] sm:$0xff] %v1656_v51  ;;  %v1569_v59 = vpop.f32.mrb[49].mxu1  ;;  %v1658_v54 = vpop.f32.mrb[49].mxu0  ;;  %3790 = vmatpush1.bf16.msra.mxu0 %v5173_v14  ;;  %3846 = vmatpush1.bf16.msra.mxu1 %v5173_v14 }
 0x275   :  { %v1692_v15 = vmax.f32 %v1569_v59, 0.0  ;;  %3151 = vst [vmem:[%s5818_s11 + $0x68] sm:$0xff] %v1569_v59  ;;  %v1694_v27 = vmax.f32 %v1658_v54, 0.0  ;;  %3153 = vst [vmem:[%s5818_s11 + $0x78] sm:$0xff] %v1658_v54  ;;  %3792 = vmatprep.subr.bf16.mxu0 %v5231_v32  ;;  %3848 = vmatprep.subr.bf16.mxu1 %v5231_v32 }
 0x276   :  { %v1779_v34 = vmul.f32 %v5055_v6, %v1691_v52  ;;  %v1781_v60 = vmul.f32 %v5055_v6, %v1693_v42 }
 0x277   :  { %v1780_v14 = vmul.f32 %v5055_v6, %v1692_v15  ;;  %v1782_v8 = vmul.f32 %v5055_v6, %v1694_v27  ;;  %v1573_v19 = vpop.f32.mrb[50].mxu1  ;;  %v1662_v38 = vpop.f32.mrb[50].mxu0 }
 0x278   :  { %v1707_v23 = vmax.f32 %v1573_v19, 0.0  ;;  %3166 = vst [vmem:[%s5818_s11 + $0xe0] sm:$0xff] %v1573_v19  ;;  %v1709_v24 = vmax.f32 %v1662_v38, 0.0  ;;  %3168 = vst [vmem:[%s5818_s11 + $0xf0] sm:$0xff] %v1662_v38  ;;  %v1575_v25 = vpop.f32.mrb[51].mxu1  ;;  %v1664_v26 = vpop.f32.mrb[51].mxu0  ;;  %3794 = vmatpush1.bf16.msra.mxu0 %v5223_v7  ;;  %3850 = vmatpush1.bf16.msra.mxu1 %v5223_v7  ;;  %v1867_v30 = vadd.f32 %v5065_v44, %v1779_v34 }
 0x279   :  { %v1708_v33 = vmax.f32 %v1575_v25, 0.0  ;;  %3167 = vst [vmem:[%s5818_s11 + $0xe8] sm:$0xff] %v1575_v25  ;;  %v1710_v6 = vmax.f32 %v1664_v26, 0.0  ;;  %3169 = vst [vmem:[%s5818_s11 + $0xf8] sm:$0xff] %v1664_v26  ;;  %3796 = vmatprep.subr.bf16.mxu0 %v5281_v40  ;;  %3852 = vmatprep.subr.bf16.mxu1 %v5281_v40  ;;  %v1869_v36 = vadd.f32 %v5065_v44, %v1781_v60 }
 0x27a   :  { %v1795_v55 = vmul.f32 %v5053_v5, %v1707_v23  ;;  %v1797_v17 = vmul.f32 %v5053_v5, %v1709_v24  ;;  %v1868_v53 = vadd.f32 %v5065_v44, %v1780_v14  ;;  %v1870_v20 = vadd.f32 %v5065_v44, %v1782_v8 }
 0x27b   :  { %v1796_v22 = vmul.f32 %v5053_v5, %v1708_v33  ;;  %v1798_v29 = vmul.f32 %v5053_v5, %v1710_v6  ;;  %v1579_v63 = vpop.f32.mrb[52].mxu1  ;;  %v1668_v48 = vpop.f32.mrb[52].mxu0 }
 0x27c   :  { %v1883_v62 = vadd.f32 %v5063_v18, %v1795_v55  ;;  %v1885_v56 = vadd.f32 %v5063_v18, %v1797_v17  ;;  %v1723_v39 = vmax.f32 %v1579_v63, 0.0  ;;  %3182 = vst [vmem:[%s5818_s11 + $0x160] sm:$0xff] %v1579_v63  ;;  %v1725_v45 = vmax.f32 %v1668_v48, 0.0  ;;  %3184 = vst [vmem:[%s5818_s11 + $0x170] sm:$0xff] %v1668_v48  ;;  %v1581_v44 = vpop.f32.mrb[53].mxu1  ;;  %v1670_v46 = vpop.f32.mrb[53].mxu0  ;;  %3798 = vmatpush1.bf16.msra.mxu0 %v5273_v58 }
 0x27d   :  { %3854 = vmatpush1.bf16.msra.mxu1 %v5273_v58  ;;  %v1884_v5 = vadd.f32 %v5063_v18, %v1796_v22  ;;  %v1886_v43 = vadd.f32 %v5063_v18, %v1798_v29  ;;  %v1724_v49 = vmax.f32 %v1581_v44, 0.0  ;;  %3183 = vst [vmem:[%s5818_s11 + $0x168] sm:$0xff] %v1581_v44  ;;  %v1726_v51 = vmax.f32 %v1670_v46, 0.0  ;;  %3185 = vst [vmem:[%s5818_s11 + $0x178] sm:$0xff] %v1670_v46 }
 0x27e   :  { %3800 = vmatprep.subr.bf16.mxu0 %v5266_v47  ;;  %3856 = vmatprep.subr.bf16.mxu1 %v5266_v47  ;;  %v5513_v52 = vpack.c.bf16 %v1883_v62, %v1867_v30  ;;  %v5515_v42 = vpack.c.bf16 %v1885_v56, %v1869_v36  ;;  %v1811_v54 = vmul.f32 %v5090_v16, %v1723_v39 }
 0x27f   :  { %v5517_v59 = vpack.c.bf16 %v1884_v5, %v1868_v53  ;;  %v5519_v18 = vpack.c.bf16 %v1886_v43, %v1870_v20  ;;  %v1813_v15 = vmul.f32 %v5090_v16, %v1725_v45  ;;  %v1585_v27 = vpop.f32.mrb[54].mxu1  ;;  %v1674_v34 = vpop.f32.mrb[54].mxu0  ;;  %v1812_v60 = vmul.f32 %v5090_v16, %v1724_v49 }
 0x280   :  { %v1739_v14 = vmax.f32 %v1585_v27, 0.0  ;;  %3198 = vst [vmem:[%s5818_s11 + $0x1e0] sm:$0x3f] %v1585_v27  ;;  %v1741_v8 = vmax.f32 %v1674_v34, 0.0  ;;  %3200 = vst [vmem:[%s5818_s11 + $0x1f0] sm:$0x3f] %v1674_v34  ;;  %3802 = vmatpush1.bf16.msra.mxu0 %v5231_v32  ;;  %v1814_v23 = vmul.f32 %v5090_v16, %v1726_v51  ;;  %v1899_v16 = vadd.f32 %v5131_v9, %v1811_v54 }
 0x281   :  { %v1587_v19 = vpop.f32.mrb[55].mxu1  ;;  %v1676_v38 = vpop.f32.mrb[55].mxu0  ;;  %3858 = vmatpush1.bf16.msra.mxu1 %v5231_v32  ;;  %3804 = vmatprep.subr.bf16.mxu0 %v5301_v10  ;;  %v1901_v6 = vadd.f32 %v5131_v9, %v1813_v15  ;;  %v1900_v55 = vadd.f32 %v5131_v9, %v1812_v60 }
 0x282   :  { %v1740_v24 = vmax.f32 %v1587_v19, 0.0  ;;  %3199 = vst [vmem:[%s5818_s11 + $0x1e8] sm:$0x3f] %v1587_v19  ;;  %v1742_v25 = vmax.f32 %v1676_v38, 0.0  ;;  %3201 = vst [vmem:[%s5818_s11 + $0x1f8] sm:$0x3f] %v1676_v38  ;;  %3860 = vmatprep.subr.bf16.mxu1 %v5301_v10  ;;  %v1827_v26 = vmul.f32 %v5083_v37, %v1739_v14  ;;  %v1829_v33 = vmul.f32 %v5083_v37, %v1741_v8 }
 0x283   :  { %v1902_v20 = vadd.f32 %v5131_v9, %v1814_v23  ;;  %s4283_s11 = smov [#allocation8]  }
 0x284   :  { %v1828_v30 = vmul.f32 %v5083_v37, %v1740_v24  ;;  %v1830_v36 = vmul.f32 %v5083_v37, %v1742_v25  ;;  %v1915_v17 = vadd.f32 %v5129_v2, %v1827_v26  ;;  %v1917_v53 = vadd.f32 %v5129_v2, %v1829_v33  ;;  %3806 = vmatpush1.bf16.msra.mxu0 %v5281_v40  ;;  %s3208_s30 = sshll.u32 %s4283_s11, 4  ;;  %s3209_s30 = int_to_ptr.vmem [resolvable:$true] %s3208_s30 }
 0x285   :  { %3862 = vmatpush1.bf16.msra.mxu1 %v5281_v40  ;;  %3808 = vmatprep.subr.bf16.mxu0 %v5270_v35  ;;  %s4246_s3 = scalar_lea.vmem %s3209_s30, 2048  ;;  %p4251_p11 = scmp.lt.s32.totalorder %s3209_s30, %s3209_s30 }
 0x286   :  { %v1916_v22 = vadd.f32 %v5129_v2, %v1828_v30  ;;  %v1918_v29 = vadd.f32 %v5129_v2, %v1830_v36  ;;  %3864 = vmatprep.subr.bf16.mxu1 %v5270_v35  ;;  %v5557_v37 = vpack.c.bf16 %v1915_v17, %v1899_v16  ;;  %v5559_v63 = vpack.c.bf16 %v1917_v53, %v1901_v6  ;;  %p4247_p10 = scmp.ne.s32.totalorder %s3209_s30, %s4246_s3  ;;  %p4252_p12 = scmp.lt.s32.totalorder %s4246_s3, %s4246_s3 }
 0x288   :  { %v5561_v48 = vpack.c.bf16 %v1916_v22, %v1900_v55  ;;  %v5563_v62 = vpack.c.bf16 %v1918_v29, %v1902_v20  ;;  %3810 = vmatpush1.bf16.msra.mxu0 %v5266_v47  ;;  %p4253_p13 = por %p4252_p12, %p4251_p11 }
 0x289   :  { %3866 = vmatpush1.bf16.msra.mxu1 %v5266_v47  ;;  %3812 = vmatprep.subr.bf16.mxu0 %v5303_v11 }
 0x28a   :  { %3868 = vmatprep.subr.bf16.mxu1 %v5303_v11  ;;  %p4254_p0 = pnand %p4253_p13, %p4247_p10 }
 0x28c   :  { %3814 = vmatpush1.bf16.msra.mxu0 %v5301_v10 }
 0x28d   :  { %3870 = vmatpush1.bf16.msra.mxu1 %v5301_v10  ;;  %3816 = vmatprep.subr.bf16.mxu0 %v5360_v61 }
 0x28e   :  { %3872 = vmatprep.subr.bf16.mxu1 %v5360_v61 }
 0x290   :  { %3818 = vmatpush1.bf16.msra.mxu0 %v5270_v35 }
 0x291   :  { %3874 = vmatpush1.bf16.msra.mxu1 %v5270_v35  ;;  %3820 = vmatprep.subr.bf16.mxu0 %v5412_v21 }
 0x292   :  { %3876 = vmatprep.subr.bf16.mxu1 %v5412_v21 }
 0x294   :  { %3822 = vmatpush1.bf16.msra.mxu0 %v5303_v11 }
 0x295   :  { %3878 = vmatpush1.bf16.msra.mxu1 %v5303_v11  ;;  %3824 = vmatprep.subr.bf16.mxu0 %v5367_v41 }
 0x296   :  { %3880 = vmatprep.subr.bf16.mxu1 %v5367_v41 }
 0x297   :  { %2275 = vmatmul.mubr.f32.vlgmr.msra.gmra.mrb[58].mxu0 %v5295_v50 }
 0x298   :  { %3826 = vmatpush1.bf16.msra.mxu0 %v5360_v61  ;;  %2345 = vmatprep.mubr.f32.mxu0 %v4280_v1 }
 0x299   :  { %3882 = vmatpush1.bf16.msra.mxu1 %v5360_v61  ;;  %3828 = vmatprep.subr.bf16.mxu0 %v5420_v28 }
 0x29a   :  { %3884 = vmatprep.subr.bf16.mxu1 %v5420_v28 }
 0x29c   :  { %3830 = vmatpush1.bf16.msra.mxu0 %v5412_v21 }
 0x29d   :  { %3886 = vmatpush1.bf16.msra.mxu1 %v5412_v21  ;;  %3904 = vmatprep.subr.bf16.mxu0 %v5231_v32 }
 0x29e   :  { %3888 = vmatprep.subr.bf16.mxu1 %v5403_v31 }
 0x29f   :  { %3280 = vmatmul.mubr.msk.f32.vlgmr.msra.gmra.mrb[58].mxu0 %vm1922_vm2, %v5313_v13 }
 0x2a0   :  { %3906 = vmatpush1.bf16.msra.mxu0 %v5223_v7  ;;  %2558 = vmatprep.mubr.f32.mxu0 %v5049_v4  ;;  %v5618_v4 = vld [vmem:[#allocation7 + $0x8] sm:$0xff] }
 0x2a1   :  { %3890 = vmatpush1.bf16.msra.mxu1 %v5367_v41  ;;  %3908 = vmatprep.subr.bf16.mxu0 %v5281_v40 }
 0x2a2   :  { %3892 = vmatprep.subr.bf16.mxu1 %v5439_v3 }
 0x2a4   :  { %3910 = vmatpush1.bf16.msra.mxu0 %v5273_v58 }
 0x2a5   :  { %3894 = vmatpush1.bf16.msra.mxu1 %v5420_v28  ;;  %3912 = vmatprep.subr.bf16.mxu0 %v5266_v47 }
 0x2a6   :  { %3896 = vmatprep.subr.bf16.mxu1 %v5409_v57 }
 0x2a8   :  { %2417 = vmatmul.mubr.f32.vlgmr.msra.gmra.mrb[58].mxu1 %v5295_v50  ;;  %3914 = vmatpush1.bf16.msra.mxu0 %v5231_v32  ;;  %v5754_v32 = vpop.permute.xlu0 %3081 }
 0x2a9   :  { %3898 = vmatpush1.bf16.msra.mxu1 %v5403_v31  ;;  %3916 = vmatprep.subr.bf16.mxu0 %v5301_v10 }
 0x2aa   :  { %3900 = vmatprep.subr.bf16.mxu1 %v5443_v12  ;;  %2487 = vmatprep.mubr.f32.mxu1 %v4280_v1 }
 0x2ac   :  { %3918 = vmatpush1.bf16.msra.mxu0 %v5281_v40 }
 0x2ad   :  { %3902 = vmatpush1.bf16.msra.mxu1 %v5439_v3  ;;  %3920 = vmatprep.subr.bf16.mxu0 %v5270_v35 }
 0x2ae   :  { %3976 = vmatprep.subr.bf16.mxu1 %v5270_v35 }
 0x2b0   :  { %3281 = vmatmul.mubr.msk.f32.vlgmr.msra.gmra.mrb[58].mxu1 %vm1922_vm2, %v5313_v13  ;;  %3922 = vmatpush1.bf16.msra.mxu0 %v5266_v47 }
 0x2b1   :  { %3978 = vmatpush1.bf16.msra.mxu1 %v5266_v47  ;;  %3924 = vmatprep.subr.bf16.mxu0 %v5303_v11 }
 0x2b2   :  { %3980 = vmatprep.subr.bf16.mxu1 %v5303_v11  ;;  %2700 = vmatprep.mubr.f32.mxu1 %v5618_v4 }
 0x2b4   :  { %3926 = vmatpush1.bf16.msra.mxu0 %v5301_v10 }
 0x2b5   :  { %3982 = vmatpush1.bf16.msra.mxu1 %v5301_v10  ;;  %3928 = vmatprep.subr.bf16.mxu0 %v5360_v61 }
 0x2b6   :  { %3984 = vmatprep.subr.bf16.mxu1 %v5360_v61 }
 0x2b8   :  { %3930 = vmatpush1.bf16.msra.mxu0 %v5270_v35 }
 0x2b9   :  { %3986 = vmatpush1.bf16.msra.mxu1 %v5270_v35  ;;  %3932 = vmatprep.subr.bf16.mxu0 %v5412_v21  ;;  %v5760_v35 = vpop.permute.xlu1 %3103 }
 0x2ba   :  { %3988 = vmatprep.subr.bf16.mxu1 %v5412_v21 }
 0x2bc   :  { %3934 = vmatpush1.bf16.msra.mxu0 %v5303_v11 }
 0x2bd   :  { %3990 = vmatpush1.bf16.msra.mxu1 %v5303_v11  ;;  %3936 = vmatprep.subr.bf16.mxu0 %v5367_v41 }
 0x2be   :  { %3992 = vmatprep.subr.bf16.mxu1 %v5367_v41 }
 0x2c0   :  { %3938 = vmatpush1.bf16.msra.mxu0 %v5360_v61 }
 0x2c1   :  { %3994 = vmatpush1.bf16.msra.mxu1 %v5360_v61  ;;  %3940 = vmatprep.subr.bf16.mxu0 %v5420_v28 }
 0x2c2   :  { %3996 = vmatprep.subr.bf16.mxu1 %v5420_v28 }
 0x2c4   :  { %3942 = vmatpush1.bf16.msra.mxu0 %v5412_v21 }
 0x2c5   :  { %3998 = vmatpush1.bf16.msra.mxu1 %v5412_v21  ;;  %3944 = vmatprep.subr.bf16.mxu0 %v5403_v31 }
 0x2c6   :  { %4000 = vmatprep.subr.bf16.mxu1 %v5403_v31 }
 0x2c8   :  { %3946 = vmatpush1.bf16.msra.mxu0 %v5367_v41 }
 0x2c9   :  { %4002 = vmatpush1.bf16.msra.mxu1 %v5367_v41  ;;  %3948 = vmatprep.subr.bf16.mxu0 %v5439_v3 }
 0x2ca   :  { %4004 = vmatprep.subr.bf16.mxu1 %v5439_v3 }
 0x2cc   :  { %3950 = vmatpush1.bf16.msra.mxu0 %v5420_v28 }
 0x2cd   :  { %4006 = vmatpush1.bf16.msra.mxu1 %v5420_v28  ;;  %3952 = vmatprep.subr.bf16.mxu0 %v5409_v57 }
 0x2ce   :  { %4008 = vmatprep.subr.bf16.mxu1 %v5409_v57 }
 0x2d0   :  { %3954 = vmatpush1.bf16.msra.mxu0 %v5403_v31 }
 0x2d1   :  { %4010 = vmatpush1.bf16.msra.mxu1 %v5403_v31  ;;  %3956 = vmatprep.subr.bf16.mxu0 %v5443_v12 }
 0x2d2   :  { %4012 = vmatprep.subr.bf16.mxu1 %v5443_v12 }
 0x2d4   :  { %3958 = vmatpush1.bf16.msra.mxu0 %v5439_v3 }
 0x2d5   :  { %4014 = vmatpush1.bf16.msra.mxu1 %v5439_v3  ;;  %3960 = vmatprep.subr.bf16.mxu0 %v5513_v52 }
 0x2d6   :  { %4016 = vmatprep.subr.bf16.mxu1 %v5513_v52 }
 0x2d8   :  { %3962 = vmatpush1.bf16.msra.mxu0 %v5409_v57 }
 0x2d9   :  { %4018 = vmatpush1.bf16.msra.mxu1 %v5409_v57  ;;  %3964 = vmatprep.subr.bf16.mxu0 %v5557_v37 }
 0x2da   :  { %4020 = vmatprep.subr.bf16.mxu1 %v5557_v37 }
 0x2dc   :  { %3966 = vmatpush1.bf16.msra.mxu0 %v5443_v12 }
 0x2dd   :  { %4022 = vmatpush1.bf16.msra.mxu1 %v5443_v12  ;;  %3968 = vmatprep.subr.bf16.mxu0 %v5517_v59 }
 0x2de   :  { %4024 = vmatprep.subr.bf16.mxu1 %v5517_v59 }
 0x2df   :  { %2559 = vmatmul.mubr.f32.vlgmr.msra.gmra.mrb[60].mxu0 %v5295_v50 }
 0x2e0   :  { %3970 = vmatpush1.bf16.msra.mxu0 %v5513_v52  ;;  %2629 = vmatprep.mubr.f32.mxu0 %v4280_v1 }
 0x2e1   :  { %4026 = vmatpush1.bf16.msra.mxu1 %v5513_v52  ;;  %3972 = vmatprep.subr.bf16.mxu0 %v5561_v48 }
 0x2e2   :  { %4028 = vmatprep.subr.bf16.mxu1 %v5561_v48 }
 0x2e4   :  { %3974 = vmatpush1.bf16.msra.mxu0 %v5557_v37 }
 0x2e5   :  { %4030 = vmatpush1.bf16.msra.mxu1 %v5557_v37  ;;  %4048 = vmatprep.subr.bf16.mxu0 %v5367_v41 }
 0x2e6   :  { %4032 = vmatprep.subr.bf16.mxu1 %v5515_v42 }
 0x2e7   :  { %3282 = vmatmul.mubr.msk.f32.vlgmr.msra.gmra.mrb[60].mxu0 %vm1922_vm2, %v5313_v13 }
 0x2e8   :  { %4050 = vmatpush1.bf16.msra.mxu0 %v5360_v61  ;;  %2842 = vmatprep.mubr.f32.mxu0 %v5618_v4 }
 0x2e9   :  { %4034 = vmatpush1.bf16.msra.mxu1 %v5517_v59  ;;  %4052 = vmatprep.subr.bf16.mxu0 %v5420_v28 }
 0x2ea   :  { %4036 = vmatprep.subr.bf16.mxu1 %v5559_v63 }
 0x2ec   :  { %4054 = vmatpush1.bf16.msra.mxu0 %v5412_v21 }
 0x2ed   :  { %4038 = vmatpush1.bf16.msra.mxu1 %v5561_v48  ;;  %4056 = vmatprep.subr.bf16.mxu0 %v5403_v31 }
 0x2ee   :  { %4040 = vmatprep.subr.bf16.mxu1 %v5519_v18 }
 0x2f0   :  { %2701 = vmatmul.mubr.f32.vlgmr.msra.gmra.mrb[60].mxu1 %v5295_v50  ;;  %4058 = vmatpush1.bf16.msra.mxu0 %v5367_v41 }
 0x2f1   :  { %4042 = vmatpush1.bf16.msra.mxu1 %v5515_v42  ;;  %4060 = vmatprep.subr.bf16.mxu0 %v5439_v3 }
 0x2f2   :  { %4044 = vmatprep.subr.bf16.mxu1 %v5563_v62  ;;  %2771 = vmatprep.mubr.f32.mxu1 %v4280_v1 }
 0x2f4   :  { %4062 = vmatpush1.bf16.msra.mxu0 %v5420_v28 }
 0x2f5   :  { %4046 = vmatpush1.bf16.msra.mxu1 %v5559_v63  ;;  %4064 = vmatprep.subr.bf16.mxu0 %v5409_v57 }
 0x2f6   :  { %3290 = vmatprep.subr.mxu1 %v4280_v1 }
 0x2f8   :  { %3283 = vmatmul.mubr.msk.f32.vlgmr.msra.gmra.mrb[60].mxu1 %vm1922_vm2, %v5313_v13  ;;  %4066 = vmatpush1.bf16.msra.mxu0 %v5403_v31 }
 0x2f9   :  { %3291 = vmatpush3.msra.mxu1 %v4280_v1  ;;  %4068 = vmatprep.subr.bf16.mxu0 %v5443_v12 }
 0x2fa   :  { %4110 = vmatprep.subr.bf16.mxu1 %v5409_v57  ;;  %3292 = vmatprep.mubr.msk.f32.mxu1 %vm4282_vm3, %v4280_v1 }
 0x2fc   :  { %3293 = vmatmul.mubr.msk.f32.vlgmr.msra.gmra.mrb[62].mxu1 %vm1922_vm2, %v5313_v13  ;;  %4070 = vmatpush1.bf16.msra.mxu0 %v5439_v3 }
 0x2fd   :  { %4112 = vmatpush1.bf16.msra.mxu1 %v5403_v31  ;;  %4072 = vmatprep.subr.bf16.mxu0 %v5513_v52 }
 0x2fe   :  { %4114 = vmatprep.subr.bf16.mxu1 %v5443_v12  ;;  %2984 = vmatprep.mubr.f32.mxu1 %v5618_v4 }
 0x300   :  { %4074 = vmatpush1.bf16.msra.mxu0 %v5409_v57 }
 0x301   :  { %4116 = vmatpush1.bf16.msra.mxu1 %v5439_v3  ;;  %4076 = vmatprep.subr.bf16.mxu0 %v5557_v37 }
 0x302   :  { %4118 = vmatprep.subr.bf16.mxu1 %v5513_v52 }
 0x304   :  { %4078 = vmatpush1.bf16.msra.mxu0 %v5443_v12 }
 0x305   :  { %4120 = vmatpush1.bf16.msra.mxu1 %v5409_v57  ;;  %4080 = vmatprep.subr.bf16.mxu0 %v5517_v59 }
 0x306   :  { %4122 = vmatprep.subr.bf16.mxu1 %v5557_v37 }
 0x308   :  { %4082 = vmatpush1.bf16.msra.mxu0 %v5513_v52 }
 0x309   :  { %4124 = vmatpush1.bf16.msra.mxu1 %v5443_v12  ;;  %4084 = vmatprep.subr.bf16.mxu0 %v5561_v48 }
 0x30a   :  { %4126 = vmatprep.subr.bf16.mxu1 %v5517_v59 }
 0x30c   :  { %4086 = vmatpush1.bf16.msra.mxu0 %v5557_v37 }
 0x30d   :  { %4128 = vmatpush1.bf16.msra.mxu1 %v5513_v52  ;;  %4088 = vmatprep.subr.bf16.mxu0 %v5515_v42 }
 0x30e   :  { %4130 = vmatprep.subr.bf16.mxu1 %v5561_v48 }
 0x310   :  { %4090 = vmatpush1.bf16.msra.mxu0 %v5517_v59 }
 0x311   :  { %4132 = vmatpush1.bf16.msra.mxu1 %v5557_v37  ;;  %4092 = vmatprep.subr.bf16.mxu0 %v5559_v63 }
 0x312   :  { %4134 = vmatprep.subr.bf16.mxu1 %v5515_v42 }
 0x314   :  { %4094 = vmatpush1.bf16.msra.mxu0 %v5561_v48 }
 0x315   :  { %4136 = vmatpush1.bf16.msra.mxu1 %v5517_v59  ;;  %4096 = vmatprep.subr.bf16.mxu0 %v5519_v18 }
 0x316   :  { %4138 = vmatprep.subr.bf16.mxu1 %v5559_v63 }
 0x318   :  { %4098 = vmatpush1.bf16.msra.mxu0 %v5515_v42 }
 0x319   :  { %4140 = vmatpush1.bf16.msra.mxu1 %v5561_v48  ;;  %4100 = vmatprep.subr.bf16.mxu0 %v5563_v62 }
 0x31a   :  { %4142 = vmatprep.subr.bf16.mxu1 %v5519_v18 }
 0x31c   :  { %4102 = vmatpush1.bf16.msra.mxu0 %v5559_v63 }
 0x31d   :  { %4144 = vmatpush1.bf16.msra.mxu1 %v5515_v42  ;;  %4103 = vmatprep.subr.bf16.mxu0 %v4279_v0 }
 0x31e   :  { %4146 = vmatprep.subr.bf16.mxu1 %v5563_v62 }
 0x320   :  { %4105 = vmatpush1.bf16.msra.mxu0 %v5519_v18 }
 0x321   :  { %4148 = vmatpush1.bf16.msra.mxu1 %v5559_v63  ;;  %4106 = vmatprep.subr.bf16.mxu0 %v4279_v0 }
 0x322   :  { %4149 = vmatprep.subr.bf16.mxu1 %v4279_v0 }
 0x324   :  { %4108 = vmatpush1.bf16.msra.mxu0 %v5563_v62 }
 0x325   :  { %4151 = vmatpush1.bf16.msra.mxu1 %v5519_v18 }
 0x326   :  { %4152 = vmatprep.subr.bf16.mxu1 %v4279_v0 }
 0x327   :  { %2843 = vmatmul.mubr.f32.vlgmr.msra.gmra.mrb[62].mxu0 %v5295_v50 }
 0x329   :  { %4154 = vmatpush1.bf16.msra.mxu1 %v5563_v62 }
 0x32a   :  { %3295 = vmatprep.subr.mxu1 %v4280_v1  ;;  %v2063_v2 = vpop.f32.mrb[56].mxu0 }
 0x32b   :  { %v3062_v9 = vmax.f32 %v2063_v2, 0.0  ;;  %v2065_v7 = vpop.f32.mrb[57].mxu0 }
 0x32c   :  { %2985 = vmatmul.mubr.f32.vlgmr.msra.gmra.mrb[64].mxu1 %v5295_v50  ;;  %v3063_v47 = vmax.f32 %v2065_v7, 0.0 }
 0x32d   :  { %3296 = vmatpush3.msra.mxu1 %v4280_v1  ;;  %3297 = vmatprep.mubr.msk.f32.mxu1 %vm4282_vm3, %v4280_v1  ;;  %v3084_v0 = vmul.f32 %v5754_v32, %v3062_v9 }
 0x32e   :  { %v3085_v58 = vmul.f32 %v5754_v32, %v3063_v47 }
 0x32f   :  { %v3106_v40 = vadd.f32 %v5760_v35, %v3084_v0 }
 0x330   :  { %3298 = vmatmul.mubr.msk.f32.vlgmr.msra.gmra.mrb[66].mxu1 %vm1922_vm2, %v5313_v13  ;;  %v3107_v50 = vadd.f32 %v5760_v35, %v3085_v58 }
 0x331   :  { %3122 = vst [vmem:[#allocation8] sm:$0xff] %v3106_v40 }
 0x332   :  { %3123 = vst [vmem:[#allocation8 + $0x8] sm:$0xff] %v3107_v50 }
 0x33a   :  { %v2205_v10 = vpop.f32.mrb[56].mxu1 }
 0x33b   :  { %v3064_v11 = vmax.f32 %v2205_v10, 0.0  ;;  %v2207_v61 = vpop.f32.mrb[57].mxu1 }
 0x33c   :  { %v3065_v41 = vmax.f32 %v2207_v61, 0.0 }
 0x33d   :  { %v3086_v1 = vmul.f32 %v5754_v32, %v3064_v11 }
 0x33e   :  { %v3087_v31 = vmul.f32 %v5754_v32, %v3065_v41 }
 0x33f   :  { %v3108_v57 = vadd.f32 %v5760_v35, %v3086_v1 }
 0x340   :  { %v3109_v21 = vadd.f32 %v5760_v35, %v3087_v31 }
 0x341   :  { %3124 = vst [vmem:[#allocation8 + $0x10] sm:$0xff] %v3108_v57 }
 0x342   :  { %3125 = vst [vmem:[#allocation8 + $0x18] sm:$0xff] %v3109_v21 }
 0x372   :  { %v2347_v28 = vpop.f32.mrb[58].mxu0 }
 0x373   :  { %v3066_v13 = vmax.f32 %v2347_v28, 0.0  ;;  %v2349_v3 = vpop.f32.mrb[59].mxu0 }
 0x374   :  { %v3067_v12 = vmax.f32 %v2349_v3, 0.0 }
 0x375   :  { %v3088_v56 = vmul.f32 %v5754_v32, %v3066_v13 }
 0x376   :  { %v3089_v39 = vmul.f32 %v5754_v32, %v3067_v12 }
 0x377   :  { %v3110_v45 = vadd.f32 %v5760_v35, %v3088_v56 }
 0x378   :  { %v3111_v44 = vadd.f32 %v5760_v35, %v3089_v39 }
 0x379   :  { %3126 = vst [vmem:[#allocation8 + $0x20] sm:$0xff] %v3110_v45 }
 0x37a   :  { %3127 = vst [vmem:[#allocation8 + $0x28] sm:$0xff] %v3111_v44 }
 0x383   :  { %v2489_v46 = vpop.f32.mrb[58].mxu1 }
 0x384   :  { %v3068_v5 = vmax.f32 %v2489_v46, 0.0  ;;  %v2491_v43 = vpop.f32.mrb[59].mxu1 }
 0x385   :  { %v3069_v49 = vmax.f32 %v2491_v43, 0.0 }
 0x386   :  { %v3090_v51 = vmul.f32 %v5754_v32, %v3068_v5 }
 0x387   :  { %v3091_v52 = vmul.f32 %v5754_v32, %v3069_v49 }
 0x388   :  { %v3112_v42 = vadd.f32 %v5760_v35, %v3090_v51 }
 0x389   :  { %v3113_v59 = vadd.f32 %v5760_v35, %v3091_v52 }
 0x38a   :  { %3128 = vst [vmem:[#allocation8 + $0x30] sm:$0xff] %v3112_v42 }
 0x38b   :  { %3129 = vst [vmem:[#allocation8 + $0x38] sm:$0xff] %v3113_v59 }
 0x3ba   :  { %v2631_v18 = vpop.f32.mrb[60].mxu0 }
 0x3bb   :  { %v3070_v54 = vmax.f32 %v2631_v18, 0.0  ;;  %v2633_v15 = vpop.f32.mrb[61].mxu0 }
 0x3bc   :  { %v3071_v27 = vmax.f32 %v2633_v15, 0.0 }
 0x3bd   :  { %v3092_v34 = vmul.f32 %v5754_v32, %v3070_v54 }
 0x3be   :  { %v3093_v60 = vmul.f32 %v5754_v32, %v3071_v27 }
 0x3bf   :  { %v3114_v14 = vadd.f32 %v5760_v35, %v3092_v34 }
 0x3c0   :  { %v3115_v8 = vadd.f32 %v5760_v35, %v3093_v60 }
 0x3c1   :  { %3130 = vst [vmem:[#allocation8 + $0x40] sm:$0xff] %v3114_v14 }
 0x3c2   :  { %3131 = vst [vmem:[#allocation8 + $0x48] sm:$0xff] %v3115_v8 }
 0x3cb   :  { %v2773_v19 = vpop.f32.mrb[60].mxu1 }
 0x3cc   :  { %v3072_v38 = vmax.f32 %v2773_v19, 0.0  ;;  %v2775_v23 = vpop.f32.mrb[61].mxu1 }
 0x3cd   :  { %v3073_v24 = vmax.f32 %v2775_v23, 0.0 }
 0x3ce   :  { %v3094_v25 = vmul.f32 %v5754_v32, %v3072_v38 }
 0x3cf   :  { %v3095_v26 = vmul.f32 %v5754_v32, %v3073_v24  ;;  %v2915_v33 = vpop.f32.mrb[62].mxu1 }
 0x3d0   :  { %v3116_v16 = vadd.f32 %v5760_v35, %v3094_v25  ;;  %v3294_v6 = vpop.f32.mrb[63].mxu1 }
 0x3d1   :  { %v3117_v30 = vadd.f32 %v5760_v35, %v3095_v26 }
 0x3d2   :  { %3132 = vst [vmem:[#allocation8 + $0x50] sm:$0xff] %v3116_v16 }
 0x3d3   :  { %3133 = vst [vmem:[#allocation8 + $0x58] sm:$0xff] %v3117_v30 }
 0x3fa   :  { %v2844_v36 = vpop.f32.mrb[62].mxu0 }
 0x3fb   :  { %v2916_v55 = vadd.f32 %v2915_v33, %v2844_v36  ;;  %v2846_v17 = vpop.f32.mrb[63].mxu0 }
 0x3fc   :  { %v3075_v53 = vmax.f32 %v2846_v17, 0.0 }
 0x3fd   :  { %v3074_v20 = vmax.f32 %v2916_v55, 0.0 }
 0x3fe   :  { %v3097_v22 = vmul.f32 %v5754_v32, %v3075_v53 }
 0x3ff   :  { %v2986_v29 = vpop.f32.mrb[64].mxu1  ;;  %v3096_v37 = vmul.f32 %v5754_v32, %v3074_v20 }
 0x400   :  { %v2988_v63 = vpop.f32.mrb[65].mxu1  ;;  %v3119_v48 = vadd.f32 %v5760_v35, %v3097_v22 }
 0x401   :  { %v3077_v62 = vmax.f32 %v2988_v63, 0.0  ;;  %v3118_v4 = vadd.f32 %v5760_v35, %v3096_v37 }
 0x402   :  { %3135 = vst [vmem:[#allocation8 + $0x68] sm:$0xff] %v3119_v48 }
 0x403   :  { %v3099_v2 = vmul.f32 %v5754_v32, %v3077_v62  ;;  %v3057_v9 = vpop.f32.mrb[66].mxu1  ;;  %3134 = vst [vmem:[#allocation8 + $0x60] sm:$0xff] %v3118_v4 }
 0x404   :  { %v3058_v7 = vadd.f32 %v3057_v9, %v2986_v29  ;;  %v3299_v47 = vpop.f32.mrb[67].mxu1 }
 0x405   :  { %v3121_v0 = vadd.f32 %v5760_v35, %v3099_v2 }
 0x406   :  { %v3076_v58 = vmax.f32 %v3058_v7, 0.0 }
 0x407   :  { %3137 = vst [vmem:[#allocation8 + $0x78] sm:$0xff] %v3121_v0 }
 0x408   :  { %v3098_v40 = vmul.f32 %v5754_v32, %v3076_v58 }
 0x40a   :  { %v3120_v50 = vadd.f32 %v5760_v35, %v3098_v40 }
 0x40c   :  { %3136 = vst [vmem:[#allocation8 + $0x70] sm:$0xff] %v3120_v50 }
 0x40d   :  { %4257 = shalt.err (!%p4254_p0)
}
 0x40e   :  { %s4258_s19 = scalar_lea.hbm %s5817_s10, 2048 }
 0x40f   :  { %p4259_p1 = scmp.ne.s32.totalorder %s5817_s10, %s4258_s19  ;;  %p4262_p2 = scmp.lt.u32.totalorder %s4258_s19, %s5817_s10 }
 0x411   :  { %p4264_p3 = pnand %p4262_p2, %p4259_p1 }
 0x413   :  { %4267 = shalt.err (!%p4264_p3)
}
 0x414   :  { %3211 = dma.vmem_to_hbm [thread:$0]  %s3209_s30, 2048, %s5817_s10, [#allocation4]  }
 0x415   :  { %4272 = dma.done.wait [#allocation4], 2048  }
 0x416   :  { %4273 = vsyncadd [#allocation4], 4294965248 }
 0x417   :  { %3219 = vsyncpa [#allocation3], 1 }
 0x418   :  { %3220 = vsyncpa [#allocation6], 1 }
 0x419   :  { %3221 = vsyncpa [#allocation4], 1 }

</bundles_post_ra>
